<compile_context>
chip_gen: v6e
topology: v6e:2x2x1
jax: 0.10.0
libtpu: 0.0.40
codegen_flags: <defaults>
</compile_context>

<pallas_src>
import functools

import jax
import jax.numpy as jnp
from jax.experimental import pallas as pl
from jax.experimental.pallas import tpu as pltpu

_LANE = 128
_SUBLANE = 8
_VMEM_TARGET = 48 * 1024 * 1024   # shrink the batch tile above this footprint
_VMEM_CAP = 124 * 1024 * 1024     # never request more than this scoped VMEM


def _round_up(n, m):
    return ((n + m - 1) // m) * m


def _ceil_div(a, b):
    return -(-a // b)


def _pad2d(a, rows, cols, dtype):
    a = a.astype(dtype)
    r, c = a.shape
    return jnp.pad(a, ((0, rows - r), (0, cols - c)))


def _vae_kernel(
    latent_pad,
    x_ref, eps_ref,
    w1_ref, b1_ref,
    w2_ref, b2_ref,
    w3_ref, b3_ref,        # fused [fc31 || fc32]
    w4_ref, b4_ref,
    w5_ref, b5_ref,
    w6_ref, b6_ref,
    recon_ref, mu_ref, logvar_ref,
):
    f32 = jnp.float32
    bf16 = jnp.bfloat16

    def lin(a, w_ref, b_ref):
        # bf16 MXU matmul with f32 accumulation; bias-add stays f32.
        return jnp.dot(a.astype(bf16), w_ref[...],
                       preferred_element_type=f32) + b_ref[...]

    x = x_ref[...]

    # ---- encode ----
    h1 = jnp.maximum(lin(x, w1_ref, b1_ref), 0.0)
    h2 = jnp.maximum(lin(h1, w2_ref, b2_ref), 0.0)

    # fused latent heads: one MXU pass produces [mu || logvar]
    ml = lin(h2, w3_ref, b3_ref)
    mu = ml[:, :latent_pad]
    logvar = ml[:, latent_pad:]

    # ---- reparameterize (var_scale = 1.0), all f32 ----
    std = jnp.exp(0.5 * logvar)
    z = mu + eps_ref[...] * std

    # ---- decode ----
    h3 = jnp.maximum(lin(z, w4_ref, b4_ref), 0.0)
    h4 = jnp.maximum(lin(h3, w5_ref, b5_ref), 0.0)
    recon = lin(h4, w6_ref, b6_ref)

    recon_ref[...] = recon.astype(recon_ref.dtype)
    mu_ref[...] = mu.astype(mu_ref.dtype)
    logvar_ref[...] = logvar.astype(logvar_ref.dtype)


def vae_forward(x, eps, params, *, batch_tile=512):
    """VAE forward pass.

    x:      (B, input_dim) float32
    eps:    (B, latent_dim) float32 standard-normal noise
    params: dict w1,b1,w2,b2,w31,b31,w32,b32,w4,b4,w5,b5,w6,b6 with weights as
            (in, out) and biases as (1, out).
    returns (recon_x, mu, logvar) with unpadded shapes.
    """
    B, input_dim = x.shape
    first_dim = params["w1"].shape[1]
    second_dim = params["w2"].shape[1]
    latent_dim = params["w31"].shape[1]

    # Lane-dense padded feature dims.
    in_p = _round_up(input_dim, _LANE)
    fst_p = _round_up(first_dim, _LANE)
    snd_p = _round_up(second_dim, _LANE)
    lat_p = _round_up(latent_dim, _LANE)

    f32, bf16 = jnp.float32, jnp.bfloat16

    # Padded (and head-fused) parameters: bf16 weights (MXU operands), f32
    # biases.  Zero padding keeps the math exact on the real rows/columns;
    # padded rows of w4/w5/w6 are zero so padded latent lanes cannot leak.
    w1 = _pad2d(params["w1"], in_p, fst_p, bf16)
    b1 = _pad2d(params["b1"], 1, fst_p, f32)
    w2 = _pad2d(params["w2"], fst_p, snd_p, bf16)
    b2 = _pad2d(params["b2"], 1, snd_p, f32)
    w3 = jnp.concatenate([_pad2d(params["w31"], snd_p, lat_p, bf16),
                          _pad2d(params["w32"], snd_p, lat_p, bf16)], axis=1)
    b3 = jnp.concatenate([_pad2d(params["b31"], 1, lat_p, f32),
                          _pad2d(params["b32"], 1, lat_p, f32)], axis=1)
    w4 = _pad2d(params["w4"], lat_p, snd_p, bf16)
    b4 = _pad2d(params["b4"], 1, snd_p, f32)
    w5 = _pad2d(params["w5"], snd_p, fst_p, bf16)
    b5 = _pad2d(params["b5"], 1, fst_p, f32)
    w6 = _pad2d(params["w6"], fst_p, in_p, bf16)
    b6 = _pad2d(params["b6"], 1, in_p, f32)

    resident = [w1, b1, w2, b2, w3, b3, w4, b4, w5, b5, w6, b6]
    weight_bytes = sum(int(a.size) * a.dtype.itemsize for a in resident)

    def footprint(tb, weight_bufs):
        # Double-buffered I/O tiles: x, eps (in) + recon, mu, logvar (out), f32.
        io = 2 * 4 * tb * (2 * in_p + 3 * lat_p)
        # f32 intermediates: h1..h4, ml, z, recon.
        inter_f32 = 4 * tb * (2 * fst_p + 2 * snd_p + 3 * lat_p + in_p)
        # bf16 casts feeding the MXU.
        inter_bf16 = 2 * tb * (in_p + fst_p + 2 * snd_p + lat_p)
        return weight_bufs * weight_bytes + io + inter_f32 + inter_bf16

    # ---- batch tiling ----
    # Pad B only to the next sublane multiple per tile; use >= 2 grid steps
    # whenever possible so both v7x TensorCores get work; shrink the tile if
    # the VMEM footprint would exceed the target.
    b8 = _round_up(B, _SUBLANE)
    grid_b = max(1, _ceil_div(b8, batch_tile))
    if grid_b == 1 and b8 >= 2 * _SUBLANE:
        grid_b = 2
    tb = _round_up(_ceil_div(b8, grid_b), _SUBLANE)
    while footprint(tb, 2) > _VMEM_TARGET and tb > _SUBLANE:
        grid_b += 1
        tb = _round_up(_ceil_div(b8, grid_b), _SUBLANE)
    b_p = grid_b * tb

    x_p = _pad2d(x, b_p, in_p, f32)
    eps_p = _pad2d(eps, b_p, lat_p, f32)
    operands = [x_p, eps_p] + resident

    def batch_spec(cols):
        return pl.BlockSpec((tb, cols), lambda i: (i, 0))

    out_specs = (batch_spec(in_p), batch_spec(lat_p), batch_spec(lat_p))
    out_shapes = (
        jax.ShapeDtypeStruct((b_p, in_p), f32),   # recon  (padded)
        jax.ShapeDtypeStruct((b_p, lat_p), f32),  # mu     (padded)
        jax.ShapeDtypeStruct((b_p, lat_p), f32),  # logvar (padded)
    )

    # Cost estimate for XLA scheduling.
    layer_dims = [(in_p, fst_p), (fst_p, snd_p), (snd_p, 2 * lat_p),
                  (lat_p, snd_p), (snd_p, fst_p), (fst_p, in_p)]
    flops = 2 * b_p * sum(di * do for di, do in layer_dims)
    bytes_accessed = (sum(int(a.size) * a.dtype.itemsize for a in operands)
                      + 4 * (b_p * in_p + 2 * b_p * lat_p))
    cost = pl.CostEstimate(flops=flops, transcendentals=b_p * lat_p,
                           bytes_accessed=bytes_accessed)

    def make_call(single_buffer_weights):
        weight_bufs = 1 if single_buffer_weights else 2

        def resident_spec(arr):
            # Full-array block, same block index every step -> stays in VMEM.
            if single_buffer_weights:
                return pl.BlockSpec(arr.shape, lambda i: (0, 0),
                                    pipeline_mode=pl.Buffered(1))
            return pl.BlockSpec(arr.shape, lambda i: (0, 0))

        in_specs = ([batch_spec(in_p), batch_spec(lat_p)]
                    + [resident_spec(a) for a in resident])
        vmem_limit = int(min(max(footprint(tb, weight_bufs) + (4 << 20), 8 << 20),
                             _VMEM_CAP))
        return pl.pallas_call(
            functools.partial(_vae_kernel, lat_p),
            out_shape=out_shapes,
            grid_spec=pltpu.PrefetchScalarGridSpec(
                num_scalar_prefetch=0,
                grid=(grid_b,),
                in_specs=in_specs,
                out_specs=out_specs,
            ),
            compiler_params=pltpu.CompilerParams(
                dimension_semantics=("parallel",),
                vmem_limit_bytes=vmem_limit,
            ),
            cost_estimate=cost,
        )

    try:
        recon_p, mu_p, logvar_p = make_call(True)(*operands)
    except Exception:
        # This JAX build rejected single-buffered resident weights
        # (pl.Buffered(1)); fall back to default double-buffering.
        recon_p, mu_p, logvar_p = make_call(False)(*operands)

    # Slice only when padding was actually added (avoids an extra HBM copy).
    recon = recon_p if (b_p == B and in_p == input_dim) else recon_p[:B, :input_dim]
    mu = mu_p if (b_p == B and lat_p == latent_dim) else mu_p[:B, :latent_dim]
    logvar = logvar_p if (b_p == B and lat_p == latent_dim) else logvar_p[:B, :latent_dim]
    return recon, mu, logvar


def init_params(key, input_dim, first_layer_dim, second_layer_dim, latent_dim):
    """Deterministic synthetic init (PyTorch-style uniform fan-in bound)."""
    dims = [
        ("w1", "b1", input_dim, first_layer_dim),
        ("w2", "b2", first_layer_dim, second_layer_dim),
        ("w31", "b31", second_layer_dim, latent_dim),
        ("w32", "b32", second_layer_dim, latent_dim),
        ("w4", "b4", latent_dim, second_layer_dim),
        ("w5", "b5", second_layer_dim, first_layer_dim),
        ("w6", "b6", first_layer_dim, input_dim),
    ]
    params = {}
    keys = jax.random.split(key, 2 * len(dims))
    for i, (wname, bname, d_in, d_out) in enumerate(dims):
        bound = 1.0 / jnp.sqrt(jnp.float32(d_in))
        params[wname] = jax.random.uniform(
            keys[2 * i], (d_in, d_out), jnp.float32, minval=-bound, maxval=bound)
        params[bname] = jax.random.uniform(
            keys[2 * i + 1], (1, d_out), jnp.float32, minval=-bound, maxval=bound)
    return params


if __name__ == "__main__":
    # Small shapes consistent with the fully-connected VAE.
    batch = 8
    input_dim = 128
    first_layer_dim = 64
    second_layer_dim = 32
    latent_dim = 16

    root = jax.random.PRNGKey(0)
    k_x, k_eps, k_params = jax.random.split(root, 3)

    x = jax.random.normal(k_x, (batch, input_dim), dtype=jnp.float32)
    eps = jax.random.normal(k_eps, (batch, latent_dim), dtype=jnp.float32)
    params = init_params(k_params, input_dim, first_layer_dim, second_layer_dim,
                         latent_dim)

    recon_x, mu, logvar = vae_forward(x, eps, params)
    jax.block_until_ready((recon_x, mu, logvar))

    # Pure-JAX reference with the same bf16-matmul / f32-accumulate recipe.
    def ref_forward(x, eps, p):
        bf16, f32 = jnp.bfloat16, jnp.float32

        def lin(a, w, b):
            return jnp.dot(a.astype(bf16), w.astype(bf16),
                           preferred_element_type=f32) + b

        h1 = jnp.maximum(lin(x, p["w1"], p["b1"]), 0.0)
        h2 = jnp.maximum(lin(h1, p["w2"], p["b2"]), 0.0)
        mu_r = lin(h2, p["w31"], p["b31"])
        lv_r = lin(h2, p["w32"], p["b32"])
        z = mu_r + eps * jnp.exp(0.5 * lv_r)
        h3 = jnp.maximum(lin(z, p["w4"], p["b4"]), 0.0)
        h4 = jnp.maximum(lin(h3, p["w5"], p["b5"]), 0.0)
        return lin(h4, p["w6"], p["b6"]), mu_r, lv_r

    r_ref, mu_r, lv_r = ref_forward(x, eps, params)
    assert recon_x.shape == (batch, input_dim)
    assert mu.shape == (batch, latent_dim) and logvar.shape == (batch, latent_dim)
    assert jnp.allclose(recon_x, r_ref, atol=2e-3, rtol=2e-3)
    assert jnp.allclose(mu, mu_r, atol=2e-3, rtol=2e-3)
    assert jnp.allclose(logvar, lv_r, atol=2e-3, rtol=2e-3)

    print("KERNEL_OK")
</pallas_src>

<mosaic_0001>
module attributes {stable_mosaic.version = 11 : i64} {
  func.func @_vae_kernel(%arg0: i32, %arg1: memref<8x128xf32, #tpu.memory_space<vmem>>, %arg2: memref<8x128xf32, #tpu.memory_space<vmem>>, %arg3: memref<128x128xbf16, #tpu.memory_space<vmem>>, %arg4: memref<1x128xf32, #tpu.memory_space<vmem>>, %arg5: memref<128x128xbf16, #tpu.memory_space<vmem>>, %arg6: memref<1x128xf32, #tpu.memory_space<vmem>>, %arg7: memref<128x256xbf16, #tpu.memory_space<vmem>>, %arg8: memref<1x256xf32, #tpu.memory_space<vmem>>, %arg9: memref<128x128xbf16, #tpu.memory_space<vmem>>, %arg10: memref<1x128xf32, #tpu.memory_space<vmem>>, %arg11: memref<128x128xbf16, #tpu.memory_space<vmem>>, %arg12: memref<1x128xf32, #tpu.memory_space<vmem>>, %arg13: memref<128x128xbf16, #tpu.memory_space<vmem>>, %arg14: memref<1x128xf32, #tpu.memory_space<vmem>>, %arg15: memref<8x128xf32, #tpu.memory_space<vmem>>, %arg16: memref<8x128xf32, #tpu.memory_space<vmem>>, %arg17: memref<8x128xf32, #tpu.memory_space<vmem>>) attributes {dimension_semantics = [#tpu.dimension_semantics<parallel>], iteration_bounds = array<i64: 1>, scalar_prefetch = 0 : i64, scratch_operands = 0 : i64, tpu.core_type = #tpu.core_type<tc>, window_params = [{transform_indices = @transform_0, window_bounds = array<i64: 8, 128>}, {transform_indices = @transform_1, window_bounds = array<i64: 8, 128>}, {pipeline_mode = #tpu.pipeline_mode<synchronous>, transform_indices = @transform_2, window_bounds = array<i64: 128, 128>}, {pipeline_mode = #tpu.pipeline_mode<synchronous>, transform_indices = @transform_3, window_bounds = array<i64: 1, 128>}, {pipeline_mode = #tpu.pipeline_mode<synchronous>, transform_indices = @transform_4, window_bounds = array<i64: 128, 128>}, {pipeline_mode = #tpu.pipeline_mode<synchronous>, transform_indices = @transform_5, window_bounds = array<i64: 1, 128>}, {pipeline_mode = #tpu.pipeline_mode<synchronous>, transform_indices = @transform_6, window_bounds = array<i64: 128, 256>}, {pipeline_mode = #tpu.pipeline_mode<synchronous>, transform_indices = @transform_7, window_bounds = array<i64: 1, 256>}, {pipeline_mode = #tpu.pipeline_mode<synchronous>, transform_indices = @transform_8, window_bounds = array<i64: 128, 128>}, {pipeline_mode = #tpu.pipeline_mode<synchronous>, transform_indices = @transform_9, window_bounds = array<i64: 1, 128>}, {pipeline_mode = #tpu.pipeline_mode<synchronous>, transform_indices = @transform_10, window_bounds = array<i64: 128, 128>}, {pipeline_mode = #tpu.pipeline_mode<synchronous>, transform_indices = @transform_11, window_bounds = array<i64: 1, 128>}, {pipeline_mode = #tpu.pipeline_mode<synchronous>, transform_indices = @transform_12, window_bounds = array<i64: 128, 128>}, {pipeline_mode = #tpu.pipeline_mode<synchronous>, transform_indices = @transform_13, window_bounds = array<i64: 1, 128>}, {transform_indices = @transform_14, window_bounds = array<i64: 8, 128>}, {transform_indices = @transform_15, window_bounds = array<i64: 8, 128>}, {transform_indices = @transform_16, window_bounds = array<i64: 8, 128>}]} {
    %c0 = arith.constant 0 : index
    %c0_0 = arith.constant 0 : index
    %0 = vector.load %arg1[%c0, %c0_0] : memref<8x128xf32, #tpu.memory_space<vmem>>, vector<8x128xf32>
    %1 = arith.truncf %0 : vector<8x128xf32> to vector<8x128xbf16>
    %c0_1 = arith.constant 0 : index
    %c0_2 = arith.constant 0 : index
    %2 = vector.load %arg3[%c0_1, %c0_2] : memref<128x128xbf16, #tpu.memory_space<vmem>>, vector<128x128xbf16>
    %cst = arith.constant dense<0.000000e+00> : vector<8x128xf32>
    %3 = tpu.matmul %1, %2, %cst {dimension_numbers = #tpu.dot_dimension_numbers<[1], [0], [0], [1], [0, 0, 1, 1], [], []>} : vector<8x128xbf16>, vector<128x128xbf16>, vector<8x128xf32> -> vector<8x128xf32>
    %c0_3 = arith.constant 0 : index
    %c0_4 = arith.constant 0 : index
    %4 = vector.load %arg4[%c0_3, %c0_4] : memref<1x128xf32, #tpu.memory_space<vmem>>, vector<1x128xf32>
    %5 = vector.broadcast %4 : vector<1x128xf32> to vector<8x128xf32>
    %6 = arith.addf %3, %5 : vector<8x128xf32>
    %cst_5 = arith.constant 0.000000e+00 : f32
    %7 = vector.broadcast %cst_5 : f32 to vector<8x128xf32>
    %8 = arith.maximumf %6, %7 : vector<8x128xf32>
    %9 = arith.truncf %8 : vector<8x128xf32> to vector<8x128xbf16>
    %c0_6 = arith.constant 0 : index
    %c0_7 = arith.constant 0 : index
    %10 = vector.load %arg5[%c0_6, %c0_7] : memref<128x128xbf16, #tpu.memory_space<vmem>>, vector<128x128xbf16>
    %cst_8 = arith.constant dense<0.000000e+00> : vector<8x128xf32>
    %11 = tpu.matmul %9, %10, %cst_8 {dimension_numbers = #tpu.dot_dimension_numbers<[1], [0], [0], [1], [0, 0, 1, 1], [], []>} : vector<8x128xbf16>, vector<128x128xbf16>, vector<8x128xf32> -> vector<8x128xf32>
    %c0_9 = arith.constant 0 : index
    %c0_10 = arith.constant 0 : index
    %12 = vector.load %arg6[%c0_9, %c0_10] : memref<1x128xf32, #tpu.memory_space<vmem>>, vector<1x128xf32>
    %13 = vector.broadcast %12 : vector<1x128xf32> to vector<8x128xf32>
    %14 = arith.addf %11, %13 : vector<8x128xf32>
    %cst_11 = arith.constant 0.000000e+00 : f32
    %15 = vector.broadcast %cst_11 : f32 to vector<8x128xf32>
    %16 = arith.maximumf %14, %15 : vector<8x128xf32>
    %17 = arith.truncf %16 : vector<8x128xf32> to vector<8x128xbf16>
    %c0_12 = arith.constant 0 : index
    %c0_13 = arith.constant 0 : index
    %18 = vector.load %arg7[%c0_12, %c0_13] : memref<128x256xbf16, #tpu.memory_space<vmem>>, vector<128x256xbf16>
    %cst_14 = arith.constant dense<0.000000e+00> : vector<8x256xf32>
    %19 = tpu.matmul %17, %18, %cst_14 {dimension_numbers = #tpu.dot_dimension_numbers<[1], [0], [0], [1], [0, 0, 1, 1], [], []>} : vector<8x128xbf16>, vector<128x256xbf16>, vector<8x256xf32> -> vector<8x256xf32>
    %c0_15 = arith.constant 0 : index
    %c0_16 = arith.constant 0 : index
    %20 = vector.load %arg8[%c0_15, %c0_16] : memref<1x256xf32, #tpu.memory_space<vmem>>, vector<1x256xf32>
    %21 = vector.broadcast %20 : vector<1x256xf32> to vector<8x256xf32>
    %22 = arith.addf %19, %21 : vector<8x256xf32>
    %23 = vector.extract_strided_slice %22 {offsets = [0, 0], sizes = [8, 128], strides = [1, 1]} : vector<8x256xf32> to vector<8x128xf32>
    %24 = vector.extract_strided_slice %22 {offsets = [0, 128], sizes = [8, 128], strides = [1, 1]} : vector<8x256xf32> to vector<8x128xf32>
    %cst_17 = arith.constant 5.000000e-01 : f32
    %25 = vector.broadcast %cst_17 : f32 to vector<8x128xf32>
    %26 = arith.mulf %25, %24 : vector<8x128xf32>
    %27 = math.exp %26 : vector<8x128xf32>
    %c0_18 = arith.constant 0 : index
    %c0_19 = arith.constant 0 : index
    %28 = vector.load %arg2[%c0_18, %c0_19] : memref<8x128xf32, #tpu.memory_space<vmem>>, vector<8x128xf32>
    %29 = arith.mulf %28, %27 : vector<8x128xf32>
    %30 = arith.addf %23, %29 : vector<8x128xf32>
    %31 = arith.truncf %30 : vector<8x128xf32> to vector<8x128xbf16>
    %c0_20 = arith.constant 0 : index
    %c0_21 = arith.constant 0 : index
    %32 = vector.load %arg9[%c0_20, %c0_21] : memref<128x128xbf16, #tpu.memory_space<vmem>>, vector<128x128xbf16>
    %cst_22 = arith.constant dense<0.000000e+00> : vector<8x128xf32>
    %33 = tpu.matmul %31, %32, %cst_22 {dimension_numbers = #tpu.dot_dimension_numbers<[1], [0], [0], [1], [0, 0, 1, 1], [], []>} : vector<8x128xbf16>, vector<128x128xbf16>, vector<8x128xf32> -> vector<8x128xf32>
    %c0_23 = arith.constant 0 : index
    %c0_24 = arith.constant 0 : index
    %34 = vector.load %arg10[%c0_23, %c0_24] : memref<1x128xf32, #tpu.memory_space<vmem>>, vector<1x128xf32>
    %35 = vector.broadcast %34 : vector<1x128xf32> to vector<8x128xf32>
    %36 = arith.addf %33, %35 : vector<8x128xf32>
    %cst_25 = arith.constant 0.000000e+00 : f32
    %37 = vector.broadcast %cst_25 : f32 to vector<8x128xf32>
    %38 = arith.maximumf %36, %37 : vector<8x128xf32>
    %39 = arith.truncf %38 : vector<8x128xf32> to vector<8x128xbf16>
    %c0_26 = arith.constant 0 : index
    %c0_27 = arith.constant 0 : index
    %40 = vector.load %arg11[%c0_26, %c0_27] : memref<128x128xbf16, #tpu.memory_space<vmem>>, vector<128x128xbf16>
    %cst_28 = arith.constant dense<0.000000e+00> : vector<8x128xf32>
    %41 = tpu.matmul %39, %40, %cst_28 {dimension_numbers = #tpu.dot_dimension_numbers<[1], [0], [0], [1], [0, 0, 1, 1], [], []>} : vector<8x128xbf16>, vector<128x128xbf16>, vector<8x128xf32> -> vector<8x128xf32>
    %c0_29 = arith.constant 0 : index
    %c0_30 = arith.constant 0 : index
    %42 = vector.load %arg12[%c0_29, %c0_30] : memref<1x128xf32, #tpu.memory_space<vmem>>, vector<1x128xf32>
    %43 = vector.broadcast %42 : vector<1x128xf32> to vector<8x128xf32>
    %44 = arith.addf %41, %43 : vector<8x128xf32>
    %cst_31 = arith.constant 0.000000e+00 : f32
    %45 = vector.broadcast %cst_31 : f32 to vector<8x128xf32>
    %46 = arith.maximumf %44, %45 : vector<8x128xf32>
    %47 = arith.truncf %46 : vector<8x128xf32> to vector<8x128xbf16>
    %c0_32 = arith.constant 0 : index
    %c0_33 = arith.constant 0 : index
    %48 = vector.load %arg13[%c0_32, %c0_33] : memref<128x128xbf16, #tpu.memory_space<vmem>>, vector<128x128xbf16>
    %cst_34 = arith.constant dense<0.000000e+00> : vector<8x128xf32>
    %49 = tpu.matmul %47, %48, %cst_34 {dimension_numbers = #tpu.dot_dimension_numbers<[1], [0], [0], [1], [0, 0, 1, 1], [], []>} : vector<8x128xbf16>, vector<128x128xbf16>, vector<8x128xf32> -> vector<8x128xf32>
    %c0_35 = arith.constant 0 : index
    %c0_36 = arith.constant 0 : index
    %50 = vector.load %arg14[%c0_35, %c0_36] : memref<1x128xf32, #tpu.memory_space<vmem>>, vector<1x128xf32>
    %51 = vector.broadcast %50 : vector<1x128xf32> to vector<8x128xf32>
    %52 = arith.addf %49, %51 : vector<8x128xf32>
    %c0_37 = arith.constant 0 : index
    %c0_38 = arith.constant 0 : index
    %53 = vector.load %arg15[%c0_37, %c0_38] : memref<8x128xf32, #tpu.memory_space<vmem>>, vector<8x128xf32>
    tpu.vector_store %arg15[%c0_37, %c0_38], %52 {strides = array<i32>} : memref<8x128xf32, #tpu.memory_space<vmem>>, vector<8x128xf32>,
    %c0_39 = arith.constant 0 : index
    %c0_40 = arith.constant 0 : index
    %54 = vector.load %arg16[%c0_39, %c0_40] : memref<8x128xf32, #tpu.memory_space<vmem>>, vector<8x128xf32>
    tpu.vector_store %arg16[%c0_39, %c0_40], %23 {strides = array<i32>} : memref<8x128xf32, #tpu.memory_space<vmem>>, vector<8x128xf32>,
    %c0_41 = arith.constant 0 : index
    %c0_42 = arith.constant 0 : index
    %55 = vector.load %arg17[%c0_41, %c0_42] : memref<8x128xf32, #tpu.memory_space<vmem>>, vector<8x128xf32>
    tpu.vector_store %arg17[%c0_41, %c0_42], %24 {strides = array<i32>} : memref<8x128xf32, #tpu.memory_space<vmem>>, vector<8x128xf32>,
    return
  }
  func.func @transform_0(%arg0: i32) -> (i32, i32) {
    %c0_i32 = arith.constant 0 : i32
    %c0_i32_0 = arith.constant 0 : i32
    return %arg0, %c0_i32 : i32, i32
  }
  func.func @transform_1(%arg0: i32) -> (i32, i32) {
    %c0_i32 = arith.constant 0 : i32
    %c0_i32_0 = arith.constant 0 : i32
    return %arg0, %c0_i32 : i32, i32
  }
  func.func @transform_2(%arg0: i32) -> (i32, i32) {
    %c0_i32 = arith.constant 0 : i32
    %c0_i32_0 = arith.constant 0 : i32
    %c0_i32_1 = arith.constant 0 : i32
    return %c0_i32, %c0_i32_0 : i32, i32
  }
  func.func @transform_3(%arg0: i32) -> (i32, i32) {
    %c0_i32 = arith.constant 0 : i32
    %c0_i32_0 = arith.constant 0 : i32
    %c0_i32_1 = arith.constant 0 : i32
    return %c0_i32, %c0_i32_0 : i32, i32
  }
  func.func @transform_4(%arg0: i32) -> (i32, i32) {
    %c0_i32 = arith.constant 0 : i32
    %c0_i32_0 = arith.constant 0 : i32
    %c0_i32_1 = arith.constant 0 : i32
    return %c0_i32, %c0_i32_0 : i32, i32
  }
  func.func @transform_5(%arg0: i32) -> (i32, i32) {
    %c0_i32 = arith.constant 0 : i32
    %c0_i32_0 = arith.constant 0 : i32
    %c0_i32_1 = arith.constant 0 : i32
    return %c0_i32, %c0_i32_0 : i32, i32
  }
  func.func @transform_6(%arg0: i32) -> (i32, i32) {
    %c0_i32 = arith.constant 0 : i32
    %c0_i32_0 = arith.constant 0 : i32
    %c0_i32_1 = arith.constant 0 : i32
    return %c0_i32, %c0_i32_0 : i32, i32
  }
  func.func @transform_7(%arg0: i32) -> (i32, i32) {
    %c0_i32 = arith.constant 0 : i32
    %c0_i32_0 = arith.constant 0 : i32
    %c0_i32_1 = arith.constant 0 : i32
    return %c0_i32, %c0_i32_0 : i32, i32
  }
  func.func @transform_8(%arg0: i32) -> (i32, i32) {
    %c0_i32 = arith.constant 0 : i32
    %c0_i32_0 = arith.constant 0 : i32
    %c0_i32_1 = arith.constant 0 : i32
    return %c0_i32, %c0_i32_0 : i32, i32
  }
  func.func @transform_9(%arg0: i32) -> (i32, i32) {
    %c0_i32 = arith.constant 0 : i32
    %c0_i32_0 = arith.constant 0 : i32
    %c0_i32_1 = arith.constant 0 : i32
    return %c0_i32, %c0_i32_0 : i32, i32
  }
  func.func @transform_10(%arg0: i32) -> (i32, i32) {
    %c0_i32 = arith.constant 0 : i32
    %c0_i32_0 = arith.constant 0 : i32
    %c0_i32_1 = arith.constant 0 : i32
    return %c0_i32, %c0_i32_0 : i32, i32
  }
  func.func @transform_11(%arg0: i32) -> (i32, i32) {
    %c0_i32 = arith.constant 0 : i32
    %c0_i32_0 = arith.constant 0 : i32
    %c0_i32_1 = arith.constant 0 : i32
    return %c0_i32, %c0_i32_0 : i32, i32
  }
  func.func @transform_12(%arg0: i32) -> (i32, i32) {
    %c0_i32 = arith.constant 0 : i32
    %c0_i32_0 = arith.constant 0 : i32
    %c0_i32_1 = arith.constant 0 : i32
    return %c0_i32, %c0_i32_0 : i32, i32
  }
  func.func @transform_13(%arg0: i32) -> (i32, i32) {
    %c0_i32 = arith.constant 0 : i32
    %c0_i32_0 = arith.constant 0 : i32
    %c0_i32_1 = arith.constant 0 : i32
    return %c0_i32, %c0_i32_0 : i32, i32
  }
  func.func @transform_14(%arg0: i32) -> (i32, i32) {
    %c0_i32 = arith.constant 0 : i32
    %c0_i32_0 = arith.constant 0 : i32
    return %arg0, %c0_i32 : i32, i32
  }
  func.func @transform_15(%arg0: i32) -> (i32, i32) {
    %c0_i32 = arith.constant 0 : i32
    %c0_i32_0 = arith.constant 0 : i32
    return %arg0, %c0_i32 : i32, i32
  }
  func.func @transform_16(%arg0: i32) -> (i32, i32) {
    %c0_i32 = arith.constant 0 : i32
    %c0_i32_0 = arith.constant 0 : i32
    return %arg0, %c0_i32 : i32, i32
  }
}

module attributes {stable_mosaic.version = 11 : i64} {
  func.func @_vae_kernel(%arg0: i32, %arg1: memref<8x128xf32, #tpu.memory_space<vmem>>, %arg2: memref<8x128xf32, #tpu.memory_space<vmem>>, %arg3: memref<128x128xbf16, #tpu.memory_space<vmem>>, %arg4: memref<1x128xf32, #tpu.memory_space<vmem>>, %arg5: memref<128x128xbf16, #tpu.memory_space<vmem>>, %arg6: memref<1x128xf32, #tpu.memory_space<vmem>>, %arg7: memref<128x256xbf16, #tpu.memory_space<vmem>>, %arg8: memref<1x256xf32, #tpu.memory_space<vmem>>, %arg9: memref<128x128xbf16, #tpu.memory_space<vmem>>, %arg10: memref<1x128xf32, #tpu.memory_space<vmem>>, %arg11: memref<128x128xbf16, #tpu.memory_space<vmem>>, %arg12: memref<1x128xf32, #tpu.memory_space<vmem>>, %arg13: memref<128x128xbf16, #tpu.memory_space<vmem>>, %arg14: memref<1x128xf32, #tpu.memory_space<vmem>>, %arg15: memref<8x128xf32, #tpu.memory_space<vmem>>, %arg16: memref<8x128xf32, #tpu.memory_space<vmem>>, %arg17: memref<8x128xf32, #tpu.memory_space<vmem>>) attributes {dimension_semantics = [#tpu.dimension_semantics<parallel>], iteration_bounds = array<i64: 1>, scalar_prefetch = 0 : i64, scratch_operands = 0 : i64, tpu.core_type = #tpu.core_type<tc>, window_params = [{transform_indices = @transform_0, window_bounds = array<i64: 8, 128>}, {transform_indices = @transform_1, window_bounds = array<i64: 8, 128>}, {pipeline_mode = #tpu.pipeline_mode<synchronous>, transform_indices = @transform_2, window_bounds = array<i64: 128, 128>}, {pipeline_mode = #tpu.pipeline_mode<synchronous>, transform_indices = @transform_3, window_bounds = array<i64: 1, 128>}, {pipeline_mode = #tpu.pipeline_mode<synchronous>, transform_indices = @transform_4, window_bounds = array<i64: 128, 128>}, {pipeline_mode = #tpu.pipeline_mode<synchronous>, transform_indices = @transform_5, window_bounds = array<i64: 1, 128>}, {pipeline_mode = #tpu.pipeline_mode<synchronous>, transform_indices = @transform_6, window_bounds = array<i64: 128, 256>}, {pipeline_mode = #tpu.pipeline_mode<synchronous>, transform_indices = @transform_7, window_bounds = array<i64: 1, 256>}, {pipeline_mode = #tpu.pipeline_mode<synchronous>, transform_indices = @transform_8, window_bounds = array<i64: 128, 128>}, {pipeline_mode = #tpu.pipeline_mode<synchronous>, transform_indices = @transform_9, window_bounds = array<i64: 1, 128>}, {pipeline_mode = #tpu.pipeline_mode<synchronous>, transform_indices = @transform_10, window_bounds = array<i64: 128, 128>}, {pipeline_mode = #tpu.pipeline_mode<synchronous>, transform_indices = @transform_11, window_bounds = array<i64: 1, 128>}, {pipeline_mode = #tpu.pipeline_mode<synchronous>, transform_indices = @transform_12, window_bounds = array<i64: 128, 128>}, {pipeline_mode = #tpu.pipeline_mode<synchronous>, transform_indices = @transform_13, window_bounds = array<i64: 1, 128>}, {transform_indices = @transform_14, window_bounds = array<i64: 8, 128>}, {transform_indices = @transform_15, window_bounds = array<i64: 8, 128>}, {transform_indices = @transform_16, window_bounds = array<i64: 8, 128>}]} {
    %c0 = arith.constant 0 : index
    %c0_0 = arith.constant 0 : index
    %0 = vector.load %arg1[%c0, %c0_0] : memref<8x128xf32, #tpu.memory_space<vmem>>, vector<8x128xf32>
    %1 = arith.truncf %0 : vector<8x128xf32> to vector<8x128xbf16>
    %c0_1 = arith.constant 0 : index
    %c0_2 = arith.constant 0 : index
    %2 = vector.load %arg3[%c0_1, %c0_2] : memref<128x128xbf16, #tpu.memory_space<vmem>>, vector<128x128xbf16>
    %cst = arith.constant dense<0.000000e+00> : vector<8x128xf32>
    %3 = tpu.matmul %1, %2, %cst {dimension_numbers = #tpu.dot_dimension_numbers<[1], [0], [0], [1], [0, 0, 1, 1], [], []>} : vector<8x128xbf16>, vector<128x128xbf16>, vector<8x128xf32> -> vector<8x128xf32>
    %c0_3 = arith.constant 0 : index
    %c0_4 = arith.constant 0 : index
    %4 = vector.load %arg4[%c0_3, %c0_4] : memref<1x128xf32, #tpu.memory_space<vmem>>, vector<1x128xf32>
    %5 = vector.broadcast %4 : vector<1x128xf32> to vector<8x128xf32>
    %6 = arith.addf %3, %5 : vector<8x128xf32>
    %cst_5 = arith.constant 0.000000e+00 : f32
    %7 = vector.broadcast %cst_5 : f32 to vector<8x128xf32>
    %8 = arith.maximumf %6, %7 : vector<8x128xf32>
    %9 = arith.truncf %8 : vector<8x128xf32> to vector<8x128xbf16>
    %c0_6 = arith.constant 0 : index
    %c0_7 = arith.constant 0 : index
    %10 = vector.load %arg5[%c0_6, %c0_7] : memref<128x128xbf16, #tpu.memory_space<vmem>>, vector<128x128xbf16>
    %cst_8 = arith.constant dense<0.000000e+00> : vector<8x128xf32>
    %11 = tpu.matmul %9, %10, %cst_8 {dimension_numbers = #tpu.dot_dimension_numbers<[1], [0], [0], [1], [0, 0, 1, 1], [], []>} : vector<8x128xbf16>, vector<128x128xbf16>, vector<8x128xf32> -> vector<8x128xf32>
    %c0_9 = arith.constant 0 : index
    %c0_10 = arith.constant 0 : index
    %12 = vector.load %arg6[%c0_9, %c0_10] : memref<1x128xf32, #tpu.memory_space<vmem>>, vector<1x128xf32>
    %13 = vector.broadcast %12 : vector<1x128xf32> to vector<8x128xf32>
    %14 = arith.addf %11, %13 : vector<8x128xf32>
    %cst_11 = arith.constant 0.000000e+00 : f32
    %15 = vector.broadcast %cst_11 : f32 to vector<8x128xf32>
    %16 = arith.maximumf %14, %15 : vector<8x128xf32>
    %17 = arith.truncf %16 : vector<8x128xf32> to vector<8x128xbf16>
    %c0_12 = arith.constant 0 : index
    %c0_13 = arith.constant 0 : index
    %18 = vector.load %arg7[%c0_12, %c0_13] : memref<128x256xbf16, #tpu.memory_space<vmem>>, vector<128x256xbf16>
    %cst_14 = arith.constant dense<0.000000e+00> : vector<8x256xf32>
    %19 = tpu.matmul %17, %18, %cst_14 {dimension_numbers = #tpu.dot_dimension_numbers<[1], [0], [0], [1], [0, 0, 1, 1], [], []>} : vector<8x128xbf16>, vector<128x256xbf16>, vector<8x256xf32> -> vector<8x256xf32>
    %c0_15 = arith.constant 0 : index
    %c0_16 = arith.constant 0 : index
    %20 = vector.load %arg8[%c0_15, %c0_16] : memref<1x256xf32, #tpu.memory_space<vmem>>, vector<1x256xf32>
    %21 = vector.broadcast %20 : vector<1x256xf32> to vector<8x256xf32>
    %22 = arith.addf %19, %21 : vector<8x256xf32>
    %23 = vector.extract_strided_slice %22 {offsets = [0, 0], sizes = [8, 128], strides = [1, 1]} : vector<8x256xf32> to vector<8x128xf32>
    %24 = vector.extract_strided_slice %22 {offsets = [0, 128], sizes = [8, 128], strides = [1, 1]} : vector<8x256xf32> to vector<8x128xf32>
    %cst_17 = arith.constant 5.000000e-01 : f32
    %25 = vector.broadcast %cst_17 : f32 to vector<8x128xf32>
    %26 = arith.mulf %25, %24 : vector<8x128xf32>
    %27 = math.exp %26 : vector<8x128xf32>
    %c0_18 = arith.constant 0 : index
    %c0_19 = arith.constant 0 : index
    %28 = vector.load %arg2[%c0_18, %c0_19] : memref<8x128xf32, #tpu.memory_space<vmem>>, vector<8x128xf32>
    %29 = arith.mulf %28, %27 : vector<8x128xf32>
    %30 = arith.addf %23, %29 : vector<8x128xf32>
    %31 = arith.truncf %30 : vector<8x128xf32> to vector<8x128xbf16>
    %c0_20 = arith.constant 0 : index
    %c0_21 = arith.constant 0 : index
    %32 = vector.load %arg9[%c0_20, %c0_21] : memref<128x128xbf16, #tpu.memory_space<vmem>>, vector<128x128xbf16>
    %cst_22 = arith.constant dense<0.000000e+00> : vector<8x128xf32>
    %33 = tpu.matmul %31, %32, %cst_22 {dimension_numbers = #tpu.dot_dimension_numbers<[1], [0], [0], [1], [0, 0, 1, 1], [], []>} : vector<8x128xbf16>, vector<128x128xbf16>, vector<8x128xf32> -> vector<8x128xf32>
    %c0_23 = arith.constant 0 : index
    %c0_24 = arith.constant 0 : index
    %34 = vector.load %arg10[%c0_23, %c0_24] : memref<1x128xf32, #tpu.memory_space<vmem>>, vector<1x128xf32>
    %35 = vector.broadcast %34 : vector<1x128xf32> to vector<8x128xf32>
    %36 = arith.addf %33, %35 : vector<8x128xf32>
    %cst_25 = arith.constant 0.000000e+00 : f32
    %37 = vector.broadcast %cst_25 : f32 to vector<8x128xf32>
    %38 = arith.maximumf %36, %37 : vector<8x128xf32>
    %39 = arith.truncf %38 : vector<8x128xf32> to vector<8x128xbf16>
    %c0_26 = arith.constant 0 : index
    %c0_27 = arith.constant 0 : index
    %40 = vector.load %arg11[%c0_26, %c0_27] : memref<128x128xbf16, #tpu.memory_space<vmem>>, vector<128x128xbf16>
    %cst_28 = arith.constant dense<0.000000e+00> : vector<8x128xf32>
    %41 = tpu.matmul %39, %40, %cst_28 {dimension_numbers = #tpu.dot_dimension_numbers<[1], [0], [0], [1], [0, 0, 1, 1], [], []>} : vector<8x128xbf16>, vector<128x128xbf16>, vector<8x128xf32> -> vector<8x128xf32>
    %c0_29 = arith.constant 0 : index
    %c0_30 = arith.constant 0 : index
    %42 = vector.load %arg12[%c0_29, %c0_30] : memref<1x128xf32, #tpu.memory_space<vmem>>, vector<1x128xf32>
    %43 = vector.broadcast %42 : vector<1x128xf32> to vector<8x128xf32>
    %44 = arith.addf %41, %43 : vector<8x128xf32>
    %cst_31 = arith.constant 0.000000e+00 : f32
    %45 = vector.broadcast %cst_31 : f32 to vector<8x128xf32>
    %46 = arith.maximumf %44, %45 : vector<8x128xf32>
    %47 = arith.truncf %46 : vector<8x128xf32> to vector<8x128xbf16>
    %c0_32 = arith.constant 0 : index
    %c0_33 = arith.constant 0 : index
    %48 = vector.load %arg13[%c0_32, %c0_33] : memref<128x128xbf16, #tpu.memory_space<vmem>>, vector<128x128xbf16>
    %cst_34 = arith.constant dense<0.000000e+00> : vector<8x128xf32>
    %49 = tpu.matmul %47, %48, %cst_34 {dimension_numbers = #tpu.dot_dimension_numbers<[1], [0], [0], [1], [0, 0, 1, 1], [], []>} : vector<8x128xbf16>, vector<128x128xbf16>, vector<8x128xf32> -> vector<8x128xf32>
    %c0_35 = arith.constant 0 : index
    %c0_36 = arith.constant 0 : index
    %50 = vector.load %arg14[%c0_35, %c0_36] : memref<1x128xf32, #tpu.memory_space<vmem>>, vector<1x128xf32>
    %51 = vector.broadcast %50 : vector<1x128xf32> to vector<8x128xf32>
    %52 = arith.addf %49, %51 : vector<8x128xf32>
    %c0_37 = arith.constant 0 : index
    %c0_38 = arith.constant 0 : index
    %53 = vector.load %arg15[%c0_37, %c0_38] : memref<8x128xf32, #tpu.memory_space<vmem>>, vector<8x128xf32>
    tpu.vector_store %arg15[%c0_37, %c0_38], %52 {strides = array<i32>} : memref<8x128xf32, #tpu.memory_space<vmem>>, vector<8x128xf32>,
    %c0_39 = arith.constant 0 : index
    %c0_40 = arith.constant 0 : index
    %54 = vector.load %arg16[%c0_39, %c0_40] : memref<8x128xf32, #tpu.memory_space<vmem>>, vector<8x128xf32>
    tpu.vector_store %arg16[%c0_39, %c0_40], %23 {strides = array<i32>} : memref<8x128xf32, #tpu.memory_space<vmem>>, vector<8x128xf32>,
    %c0_41 = arith.constant 0 : index
    %c0_42 = arith.constant 0 : index
    %55 = vector.load %arg17[%c0_41, %c0_42] : memref<8x128xf32, #tpu.memory_space<vmem>>, vector<8x128xf32>
    tpu.vector_store %arg17[%c0_41, %c0_42], %24 {strides = array<i32>} : memref<8x128xf32, #tpu.memory_space<vmem>>, vector<8x128xf32>,
    return
  }
  func.func @transform_0(%arg0: i32) -> (i32, i32) {
    %c0_i32 = arith.constant 0 : i32
    %c0_i32_0 = arith.constant 0 : i32
    return %arg0, %c0_i32 : i32, i32
  }
  func.func @transform_1(%arg0: i32) -> (i32, i32) {
    %c0_i32 = arith.constant 0 : i32
    %c0_i32_0 = arith.constant 0 : i32
    return %arg0, %c0_i32 : i32, i32
  }
  func.func @transform_2(%arg0: i32) -> (i32, i32) {
    %c0_i32 = arith.constant 0 : i32
    %c0_i32_0 = arith.constant 0 : i32
    %c0_i32_1 = arith.constant 0 : i32
    return %c0_i32, %c0_i32_0 : i32, i32
  }
  func.func @transform_3(%arg0: i32) -> (i32, i32) {
    %c0_i32 = arith.constant 0 : i32
    %c0_i32_0 = arith.constant 0 : i32
    %c0_i32_1 = arith.constant 0 : i32
    return %c0_i32, %c0_i32_0 : i32, i32
  }
  func.func @transform_4(%arg0: i32) -> (i32, i32) {
    %c0_i32 = arith.constant 0 : i32
    %c0_i32_0 = arith.constant 0 : i32
    %c0_i32_1 = arith.constant 0 : i32
    return %c0_i32, %c0_i32_0 : i32, i32
  }
  func.func @transform_5(%arg0: i32) -> (i32, i32) {
    %c0_i32 = arith.constant 0 : i32
    %c0_i32_0 = arith.constant 0 : i32
    %c0_i32_1 = arith.constant 0 : i32
    return %c0_i32, %c0_i32_0 : i32, i32
  }
  func.func @transform_6(%arg0: i32) -> (i32, i32) {
    %c0_i32 = arith.constant 0 : i32
    %c0_i32_0 = arith.constant 0 : i32
    %c0_i32_1 = arith.constant 0 : i32
    return %c0_i32, %c0_i32_0 : i32, i32
  }
  func.func @transform_7(%arg0: i32) -> (i32, i32) {
    %c0_i32 = arith.constant 0 : i32
    %c0_i32_0 = arith.constant 0 : i32
    %c0_i32_1 = arith.constant 0 : i32
    return %c0_i32, %c0_i32_0 : i32, i32
  }
  func.func @transform_8(%arg0: i32) -> (i32, i32) {
    %c0_i32 = arith.constant 0 : i32
    %c0_i32_0 = arith.constant 0 : i32
    %c0_i32_1 = arith.constant 0 : i32
    return %c0_i32, %c0_i32_0 : i32, i32
  }
  func.func @transform_9(%arg0: i32) -> (i32, i32) {
    %c0_i32 = arith.constant 0 : i32
    %c0_i32_0 = arith.constant 0 : i32
    %c0_i32_1 = arith.constant 0 : i32
    return %c0_i32, %c0_i32_0 : i32, i32
  }
  func.func @transform_10(%arg0: i32) -> (i32, i32) {
    %c0_i32 = arith.constant 0 : i32
    %c0_i32_0 = arith.constant 0 : i32
    %c0_i32_1 = arith.constant 0 : i32
    return %c0_i32, %c0_i32_0 : i32, i32
  }
  func.func @transform_11(%arg0: i32) -> (i32, i32) {
    %c0_i32 = arith.constant 0 : i32
    %c0_i32_0 = arith.constant 0 : i32
    %c0_i32_1 = arith.constant 0 : i32
    return %c0_i32, %c0_i32_0 : i32, i32
  }
  func.func @transform_12(%arg0: i32) -> (i32, i32) {
    %c0_i32 = arith.constant 0 : i32
    %c0_i32_0 = arith.constant 0 : i32
    %c0_i32_1 = arith.constant 0 : i32
    return %c0_i32, %c0_i32_0 : i32, i32
  }
  func.func @transform_13(%arg0: i32) -> (i32, i32) {
    %c0_i32 = arith.constant 0 : i32
    %c0_i32_0 = arith.constant 0 : i32
    %c0_i32_1 = arith.constant 0 : i32
    return %c0_i32, %c0_i32_0 : i32, i32
  }
  func.func @transform_14(%arg0: i32) -> (i32, i32) {
    %c0_i32 = arith.constant 0 : i32
    %c0_i32_0 = arith.constant 0 : i32
    return %arg0, %c0_i32 : i32, i32
  }
  func.func @transform_15(%arg0: i32) -> (i32, i32) {
    %c0_i32 = arith.constant 0 : i32
    %c0_i32_0 = arith.constant 0 : i32
    return %arg0, %c0_i32 : i32, i32
  }
  func.func @transform_16(%arg0: i32) -> (i32, i32) {
    %c0_i32 = arith.constant 0 : i32
    %c0_i32_0 = arith.constant 0 : i32
    return %arg0, %c0_i32 : i32, i32
  }
}

</mosaic_0001>

<bundles_post_ra>
// kernel: tpu_custom_call.1
= control target key start
LH: loop header
LB: loop body
LE: loop exit
PB: predicated region body
PF: predicated region fallthrough
CT: control target
= control target key end

     0   :  { %s1671_s0 = inlined_call_operand.hbm [shape: f32[8,128], index: 0, kind: input, shape index: {}]   ;;  %s1672_s1 = inlined_call_operand.hbm [shape: f32[8,128], index: 1, kind: input, shape index: {}]   ;;  %s1673_s2 = inlined_call_operand.hbm [shape: bf16[128,128], index: 2, kind: input, shape index: {}]   ;;  %s1674_s3 = inlined_call_operand.vmem [shape: f32[1,128], index: 3, kind: input, shape index: {}]   ;;  %s1675_s4 = inlined_call_operand.hbm [shape: bf16[128,128], index: 4, kind: input, shape index: {}]   ;;  %s1676_s5 = inlined_call_operand.vmem [shape: f32[1,128], index: 5, kind: input, shape index: {}]   ;;  %s1677_s6 = inlined_call_operand.hbm [shape: bf16[128,256], index: 6, kind: input, shape index: {}]   ;;  %s1678_s7 = inlined_call_operand.vmem [shape: f32[1,256], index: 7, kind: input, shape index: {}]   ;;  %s1679_s8 = inlined_call_operand.hbm [shape: bf16[128,128], index: 8, kind: input, shape index: {}]   ;;  %s1680_s9 = inlined_call_operand.vmem [shape: f32[1,128], index: 9, kind: input, shape index: {}]   ;;  %s1681_s10 = inlined_call_operand.hbm [shape: bf16[128,128], index: 10, kind: input, shape index: {}]   ;;  %s1682_s11 = inlined_call_operand.vmem [shape: f32[1,128], index: 11, kind: input, shape index: {}]   ;;  %s1683_s12 = inlined_call_operand.hbm [shape: bf16[128,128], index: 12, kind: input, shape index: {}]   ;;  %s1684_s13 = inlined_call_operand.vmem [shape: f32[1,128], index: 13, kind: input, shape index: {}]   ;;  %s1685_s14 = inlined_call_operand.hbm [shape: f32[8,128], index: 14, kind: output, shape index: {0}]   ;;  %s1686_s15 = inlined_call_operand.hbm [shape: f32[8,128], index: 15, kind: output, shape index: {1}]   ;;  %s1687_s16 = inlined_call_operand.hbm [shape: f32[8,128], index: 16, kind: output, shape index: {2}]  }
   0x1   :  { %1688 = sst [smem:[#allocation27_spill]] %s1671_s0 }
   0x2   :  { %22 = vsyncpa [#allocation3], 0 }
   0x3   :  { %23 = vsyncpa [#allocation6], 0 }
   0x4   :  { %24 = vsyncpa [#allocation9], 0 }
   0x5   :  { %25 = vsyncpa [#allocation12], 0 }
   0x6   :  { %26 = vsyncpa [#allocation15], 0 }
   0x7   :  { %27 = vsyncpa [#allocation4], 0 }
   0x8   :  { %28 = vsyncpa [#allocation18], 0  ;;  %s1452_s21 = smov [#allocation5]  }
   0x9   :  { %s45_s22 = sshll.u32 %s1452_s21, 4  ;;  %s46_s22 = int_to_ptr.vmem [resolvable:$true] %s45_s22 }
   0xa   :  { %s1226_s23 = scalar_lea.vmem %s46_s22, 128  ;;  %p1231_p1 = scmp.lt.s32.totalorder %s46_s22, %s46_s22 }
   0xb   :  { %p1227_p0 = scmp.ne.s32.totalorder %s46_s22, %s1226_s23  ;;  %p1232_p2 = scmp.lt.s32.totalorder %s1226_s23, %s1226_s23 }
   0xd   :  { %p1233_p3 = por %p1232_p2, %p1231_p1 }
   0xf   :  { %p1234_p4 = pnand %p1233_p3, %p1227_p0 }
  0x11   :  { %1237 = shalt.err (!%p1234_p4)
}
  0x12   :  { %48 = dma.hbm_to_vmem [thread:$0]  %s1672_s1, 128, %s46_s22, [#allocation6]  }
  0x13   :  { %s1453_s26 = smov [#allocation8]   ;;  %s1454_s28 = smov [#allocation11]  }
  0x14   :  { %s68_s27 = sshll.u32 %s1453_s26, 4  ;;  %s96_s29 = sshll.u32 %s1454_s28, 4  ;;  %s69_s27 = int_to_ptr.vmem [resolvable:$true] %s68_s27  ;;  %s97_s29 = int_to_ptr.vmem [resolvable:$true] %s96_s29 }
  0x15   :  { %s1246_s30 = scalar_lea.vmem %s69_s27, 1024  ;;  %p1251_p6 = scmp.lt.s32.totalorder %s69_s27, %s69_s27 }
  0x16   :  { %p1247_p5 = scmp.ne.s32.totalorder %s69_s27, %s1246_s30  ;;  %p1252_p7 = scmp.lt.s32.totalorder %s1246_s30, %s1246_s30 }
  0x18   :  { %p1253_p8 = por %p1252_p7, %p1251_p6 }
  0x1a   :  { %p1254_p9 = pnand %p1253_p8, %p1247_p5 }
  0x1c   :  { %1257 = shalt.err (!%p1254_p9)
}
  0x1d   :  { %s1455_s0 = smov 64   ;;  %s1456_s17 = smov 4  }
  0x1e   :  { %74 = dma.hbm_to_vmem [thread:$0]  %s1675_s4, 1024, %s69_s27, [#allocation9], %s1455_s0, %s1455_s0, %s1456_s17  }
  0x1f   :  { %s1266_s1 = scalar_lea.vmem %s97_s29, 1024  ;;  %p1271_p11 = scmp.lt.s32.totalorder %s97_s29, %s97_s29 }
  0x20   :  { %p1267_p10 = scmp.ne.s32.totalorder %s97_s29, %s1266_s1  ;;  %p1272_p12 = scmp.lt.s32.totalorder %s1266_s1, %s1266_s1 }
  0x22   :  { %p1273_p13 = por %p1272_p12, %p1271_p11 }
  0x24   :  { %p1274_p0 = pnand %p1273_p13, %p1267_p10 }
  0x26   :  { %1277 = shalt.err (!%p1274_p0)
}
  0x27   :  { %102 = dma.hbm_to_vmem [thread:$0]  %s1679_s8, 1024, %s97_s29, [#allocation12], %s1455_s0, %s1455_s0, %s1456_s17  }
  0x28   :  { %s1457_s22 = smov [#allocation2]   ;;  %s1458_s24 = smov [#allocation7]  }
  0x29   :  { %s35_s23 = sshll.u32 %s1457_s22, 4  ;;  %s54_s4 = sshll.u32 %s1458_s24, 4  ;;  %s36_s23 = int_to_ptr.vmem [resolvable:$true] %s35_s23  ;;  %s55_s4 = int_to_ptr.vmem [resolvable:$true] %s54_s4 }
  0x2a   :  { %s1286_s25 = scalar_lea.vmem %s36_s23, 128  ;;  %p1291_p2 = scmp.lt.s32.totalorder %s36_s23, %s36_s23 }
  0x2b   :  { %p1287_p1 = scmp.ne.s32.totalorder %s36_s23, %s1286_s25  ;;  %p1292_p3 = scmp.lt.s32.totalorder %s1286_s25, %s1286_s25 }
  0x2d   :  { %p1293_p4 = por %p1292_p3, %p1291_p2 }
  0x2f   :  { %p1294_p5 = pnand %p1293_p4, %p1287_p1 }
  0x31   :  { %1297 = shalt.err (!%p1294_p5)
}
  0x32   :  { %s1689_s28 = sld [smem:[#allocation27_spill]]  ;;  %s1306_s30 = scalar_lea.vmem %s55_s4, 1024 }
  0x33   :  { %p1307_p6 = scmp.ne.s32.totalorder %s55_s4, %s1306_s30  ;;  %p1311_p7 = scmp.lt.s32.totalorder %s55_s4, %s55_s4 }
  0x34   :  { %p1312_p8 = scmp.lt.s32.totalorder %s1306_s30, %s1306_s30 }
  0x36   :  { %p1313_p9 = por %p1312_p8, %p1311_p7 }
  0x38   :  { %38 = dma.hbm_to_vmem [thread:$0]  %s1689_s28, 128, %s36_s23, [#allocation3]  }
  0x39   :  { %p1314_p10 = pnand %p1313_p9, %p1307_p6 }
  0x3b   :  { %1317 = shalt.err (!%p1314_p10)
}
  0x3c   :  { %60 = dma.hbm_to_vmem [thread:$0]  %s1673_s2, 1024, %s55_s4, [#allocation6], %s1455_s0, %s1455_s0, %s1456_s17  }
  0x3d   :  { %s1459_s18 = smov [#allocation10]  }
  0x3e   :  { %s82_s19 = sshll.u32 %s1459_s18, 4  ;;  %s83_s19 = int_to_ptr.vmem [resolvable:$true] %s82_s19 }
  0x3f   :  { %s1326_s1 = scalar_lea.vmem %s83_s19, 2048  ;;  %p1331_p12 = scmp.lt.s32.totalorder %s83_s19, %s83_s19 }
  0x40   :  { %p1327_p11 = scmp.ne.s32.totalorder %s83_s19, %s1326_s1  ;;  %p1332_p13 = scmp.lt.s32.totalorder %s1326_s1, %s1326_s1 }
  0x42   :  { %p1333_p0 = por %p1332_p13, %p1331_p12 }
  0x44   :  { %p1334_p1 = pnand %p1333_p0, %p1327_p11 }
  0x46   :  { %1337 = shalt.err (!%p1334_p1)
}
  0x47   :  { %s1460_s20 = smov 128   ;;  %s1461_s21 = smov 8  }
  0x48   :  { %88 = dma.hbm_to_vmem [thread:$0]  %s1677_s6, 2048, %s83_s19, [#allocation9], %s1460_s20, %s1460_s20, %s1461_s21  }
  0x49   :  { %s1462_s24 = smov [#allocation13]   ;;  %s1463_s26 = smov [#allocation14]  }
  0x4a   :  { %s110_s25 = sshll.u32 %s1462_s24, 4  ;;  %s124_s2 = sshll.u32 %s1463_s26, 4  ;;  %s111_s25 = int_to_ptr.vmem [resolvable:$true] %s110_s25  ;;  %s125_s2 = int_to_ptr.vmem [resolvable:$true] %s124_s2 }
  0x4b   :  { %s1346_s4 = scalar_lea.vmem %s111_s25, 1024  ;;  %p1351_p3 = scmp.lt.s32.totalorder %s111_s25, %s111_s25 }
  0x4c   :  { %p1347_p2 = scmp.ne.s32.totalorder %s111_s25, %s1346_s4  ;;  %p1352_p4 = scmp.lt.s32.totalorder %s1346_s4, %s1346_s4 }
  0x4e   :  { %p1353_p5 = por %p1352_p4, %p1351_p3 }
  0x50   :  { %p1354_p6 = pnand %p1353_p5, %p1347_p2 }
  0x52   :  { %1357 = shalt.err (!%p1354_p6)
}
  0x53   :  { %116 = dma.hbm_to_vmem [thread:$0]  %s1681_s10, 1024, %s111_s25, [#allocation12], %s1455_s0, %s1455_s0, %s1456_s17  }
  0x54   :  { %s1366_s6 = scalar_lea.vmem %s125_s2, 1024  ;;  %p1371_p8 = scmp.lt.s32.totalorder %s125_s2, %s125_s2 }
  0x55   :  { %p1367_p7 = scmp.ne.s32.totalorder %s125_s2, %s1366_s6  ;;  %p1372_p9 = scmp.lt.s32.totalorder %s1366_s6, %s1366_s6 }
  0x57   :  { %p1373_p10 = por %p1372_p9, %p1371_p8 }
  0x59   :  { %p1374_p11 = pnand %p1373_p10, %p1367_p7 }
  0x5b   :  { %1377 = shalt.err (!%p1374_p11)
}
  0x5c   :  { %130 = dma.hbm_to_vmem [thread:$0]  %s1683_s12, 1024, %s125_s2, [#allocation15], %s1455_s0, %s1455_s0, %s1456_s17  }
  0x5d   :  { %1438 = dma.done.wait [#allocation3], 128  }
  0x5e   :  { %1439 = vsyncadd [#allocation3], 4294967168 }
  0x5f   :  { %1440 = dma.done.wait [#allocation6], 1152  }
  0x60   :  { %1441 = vsyncadd [#allocation6], 4294966144 }
  0x61   :  { %1442 = dma.done.wait [#allocation9], 3072  }
  0x62   :  { %1443 = vsyncadd [#allocation9], 4294964224 }
  0x63   :  { %1444 = dma.done.wait [#allocation12], 2048  }
  0x64   :  { %1445 = vsyncadd [#allocation12], 4294965248 }
  0x65   :  { %1446 = dma.done.wait [#allocation15], 1024  }
  0x66   :  { %1447 = vsyncadd [#allocation15], 4294966272  ;;  %v1464_v0 = vmov 0.0   ;;  %vm1465_vm0 = vmmov 0   ;;  %v1152_v1 = vld [vmem:[#allocation7 + $0x38] sm:$0xff]   ;;  %v1153_v2 = vld [vmem:[#allocation7 + $0x30] sm:$0xff]  }
  0x67   :  { %1034 = vmatprep.subr.bf16.mxu0 %v1464_v0  ;;  %1050 = vmatprep.mubr.msk.bf16.mxu0 %vm1465_vm0, %v1464_v0  ;;  %v1154_v3 = vld [vmem:[#allocation7 + $0x28] sm:$0xff]   ;;  %v1160_v4 = vld [vmem:[#allocation8 + $0x38] sm:$0xff]   ;;  %v1155_v5 = vld [vmem:[#allocation7 + $0x20] sm:$0xff]   ;;  %v1466_v43 = vmov 0  }
  0x68   :  { %1054 = vmatprep.subr.bf16.mxu1 %v1464_v0  ;;  %1070 = vmatprep.mubr.msk.bf16.mxu1 %vm1465_vm0, %v1464_v0  ;;  %v1161_v6 = vld [vmem:[#allocation8 + $0x30] sm:$0xff]   ;;  %v1156_v7 = vld [vmem:[#allocation7 + $0x18] sm:$0xff]   ;;  %v1162_v8 = vld [vmem:[#allocation8 + $0x28] sm:$0xff]  }
  0x69   :  { %1035 = vmatpush3.bf16.msra.mxu0 %v1152_v1  ;;  %1055 = vmatpush3.bf16.msra.mxu1 %v1160_v4  ;;  %v1157_v9 = vld [vmem:[#allocation7 + $0x10] sm:$0xff]   ;;  %v1163_v10 = vld [vmem:[#allocation8 + $0x20] sm:$0xff]   ;;  %v1158_v11 = vld [vmem:[#allocation7 + $0x8] sm:$0xff]  }
  0x6a   :  { %1036 = vmatprep.subr.bf16.mxu0 %v1464_v0  ;;  %1056 = vmatprep.subr.bf16.mxu1 %v1464_v0  ;;  %v1164_v12 = vld [vmem:[#allocation8 + $0x18] sm:$0xff]   ;;  %v1159_v13 = vld [vmem:[#allocation7] sm:$0xff]   ;;  %v158_v14 = vld [vmem:[#allocation2] sm:$0xff] }
  0x6b   :  { %v1165_v15 = vld [vmem:[#allocation8 + $0x10] sm:$0xff]   ;;  %v159_v16 = vpack.c.bf16 %v158_v14, %v158_v14  ;;  %v1166_v17 = vld [vmem:[#allocation8 + $0x8] sm:$0xff]   ;;  %v1167_v18 = vld [vmem:[#allocation8] sm:$0xff]  }
  0x6c   :  { %v1168_v19 = vld [vmem:[#allocation10 + $0x70] ss:$8 sps:$4 sm:$0xff]   ;;  %v1170_v20 = vld [vmem:[#allocation10 + $0x74] ss:$8 sps:$4 sm:$0xff]   ;;  %v1173_v21 = vld [vmem:[#allocation10 + $0x64] ss:$8 sps:$4 sm:$0xff]  }
  0x6d   :  { %1037 = vmatpush3.bf16.msra.mxu0 %v1153_v2  ;;  %1057 = vmatpush3.bf16.msra.mxu1 %v1161_v6  ;;  %v1171_v22 = vld [vmem:[#allocation10 + $0x60] ss:$8 sps:$4 sm:$0xff]   ;;  %v1176_v23 = vld [vmem:[#allocation10 + $0x54] ss:$8 sps:$4 sm:$0xff]   ;;  %v1174_v24 = vld [vmem:[#allocation10 + $0x50] ss:$8 sps:$4 sm:$0xff]  }
  0x6e   :  { %1038 = vmatprep.subr.bf16.mxu0 %v1464_v0  ;;  %1058 = vmatprep.subr.bf16.mxu1 %v1464_v0  ;;  %v1179_v25 = vld [vmem:[#allocation10 + $0x44] ss:$8 sps:$4 sm:$0xff]   ;;  %v1177_v26 = vld [vmem:[#allocation10 + $0x40] ss:$8 sps:$4 sm:$0xff]   ;;  %v1182_v27 = vld [vmem:[#allocation10 + $0x34] ss:$8 sps:$4 sm:$0xff]  }
  0x6f   :  { %v1180_v28 = vld [vmem:[#allocation10 + $0x30] ss:$8 sps:$4 sm:$0xff]   ;;  %v1185_v29 = vld [vmem:[#allocation10 + $0x24] ss:$8 sps:$4 sm:$0xff]   ;;  %v1183_v30 = vld [vmem:[#allocation10 + $0x20] ss:$8 sps:$4 sm:$0xff]  }
  0x70   :  { %v1188_v31 = vld [vmem:[#allocation10 + $0x14] ss:$8 sps:$4 sm:$0xff]   ;;  %v1186_v32 = vld [vmem:[#allocation10 + $0x10] ss:$8 sps:$4 sm:$0xff]   ;;  %v1191_v41 = vld [vmem:[#allocation10 + $0x4] ss:$8 sps:$4 sm:$0xff]  }
  0x71   :  { %1039 = vmatpush3.bf16.msra.mxu0 %v1154_v3  ;;  %1059 = vmatpush3.bf16.msra.mxu1 %v1162_v8  ;;  %v928_v33 = vld [vmem:[%s1674_s3] ss:$0 sm:$0xff]  ;;  %v1189_v42 = vld [vmem:[#allocation10] ss:$8 sps:$4 sm:$0xff]   ;;  %v1192_v44 = vld [vmem:[#allocation11 + $0x38] sm:$0xff]   ;;  %v404_v3 = vlaneseq }
  0x72   :  { %1040 = vmatprep.subr.bf16.mxu0 %v1464_v0  ;;  %1060 = vmatprep.subr.bf16.mxu1 %v1464_v0  ;;  %v937_v45 = vld [vmem:[%s1676_s5] ss:$0 sm:$0xff]  ;;  %v1194_v54 = vld [vmem:[#allocation11 + $0x28] sm:$0xff]   ;;  %v1195_v55 = vld [vmem:[#allocation11 + $0x20] sm:$0xff]  }
  0x73   :  { %v1193_v53 = vld [vmem:[#allocation11 + $0x30] sm:$0xff]   ;;  %v1196_v56 = vld [vmem:[#allocation11 + $0x18] sm:$0xff]   ;;  %v1198_v58 = vld [vmem:[#allocation11 + $0x8] sm:$0xff]   ;;  %v405_v4 = vshrl.u32 %v404_v3, 7 }
  0x74   :  { %v1197_v57 = vld [vmem:[#allocation11 + $0x10] sm:$0xff]   ;;  %v1199_v59 = vld [vmem:[#allocation11] sm:$0xff]   ;;  %v1200_v60 = vld [vmem:[#allocation13 + $0x38] sm:$0xff]  }
  0x75   :  { %1041 = vmatpush3.bf16.msra.mxu0 %v1155_v5  ;;  %1061 = vmatpush3.bf16.msra.mxu1 %v1163_v10  ;;  %v1201_v61 = vld [vmem:[#allocation13 + $0x30] sm:$0xff]   ;;  %v1202_v62 = vld [vmem:[#allocation13 + $0x28] sm:$0xff]   ;;  %v1203_v63 = vld [vmem:[#allocation13 + $0x20] sm:$0xff]   ;;  %v406_v5 = vsub.s32 0, %v405_v4 }
  0x76   :  { %1042 = vmatprep.subr.bf16.mxu0 %v1464_v0  ;;  %1062 = vmatprep.subr.bf16.mxu1 %v1464_v0  ;;  %v1204_v1 = vld [vmem:[#allocation13 + $0x18] sm:$0xff]   ;;  %v1205_v2 = vld [vmem:[#allocation13 + $0x10] sm:$0xff]  }
  0x77   :  { %v402_v6 = vld [vmem:[%s1678_s7] sm:$0x3] }
  0x78   :  { %v407_v8 = vrot.slane %v402_v6, %v406_v5 }
  0x79   :  { %1043 = vmatpush3.bf16.msra.mxu0 %v1156_v7  ;;  %1063 = vmatpush3.bf16.msra.mxu1 %v1164_v12  ;;  %v410_v7 = vsub.s32 1, %v405_v4 }
  0x7a   :  { %1044 = vmatprep.subr.bf16.mxu0 %v1464_v0  ;;  %1064 = vmatprep.subr.bf16.mxu1 %v1464_v0 }
  0x7d   :  { %1045 = vmatpush3.bf16.msra.mxu0 %v1157_v9  ;;  %1065 = vmatpush3.bf16.msra.mxu1 %v1165_v15  ;;  %v411_v9 = vrot.slane %v402_v6, %v410_v7 }
  0x7e   :  { %1046 = vmatprep.subr.bf16.mxu0 %v1464_v0  ;;  %1066 = vmatprep.subr.bf16.mxu1 %v1464_v0 }
  0x81   :  { %1047 = vmatpush3.bf16.msra.mxu0 %v1158_v11  ;;  %1067 = vmatpush3.bf16.msra.mxu1 %v1166_v17 }
  0x82   :  { %1048 = vmatprep.subr.bf16.mxu0 %v1464_v0  ;;  %1068 = vmatprep.subr.bf16.mxu1 %v1464_v0 }
  0x85   :  { %1049 = vmatpush3.bf16.msra.mxu0 %v1159_v13  ;;  %1069 = vmatpush3.bf16.msra.mxu1 %v1167_v18  ;;  %v538_v18 = vld [vmem:[#allocation5] sm:$0xff] }
  0x86   :  { %1074 = vmatprep.subr.bf16.mxu1 %v1464_v0  ;;  %494 = vmatprep.subr.bf16.mxu0 %v1170_v20 }
  0x88   :  { %1051 = vmatmul.mubr.bf16.vlgmr.msra.gmra.mxu0 %v159_v16 }
  0x89   :  { %495 = vmatpush1.bf16.msra.mxu0 %v1168_v19  ;;  %526 = vmatprep.mubr.bf16.mxu0 %v1466_v43 }
  0x8a   :  { %496 = vmatprep.subr.bf16.mxu0 %v1173_v21 }
  0x8d   :  { %497 = vmatpush1.bf16.msra.mxu0 %v1171_v22 }
  0x8e   :  { %498 = vmatprep.subr.bf16.mxu0 %v1176_v23  ;;  %v1206_v23 = vld [vmem:[#allocation13 + $0x8] sm:$0xff]  }
  0x91   :  { %499 = vmatpush1.bf16.msra.mxu0 %v1174_v24  ;;  %v1207_v24 = vld [vmem:[#allocation13] sm:$0xff]  }
  0x92   :  { %500 = vmatprep.subr.bf16.mxu0 %v1179_v25  ;;  %v1208_v25 = vld [vmem:[#allocation14 + $0x38] sm:$0xff]  }
  0x95   :  { %501 = vmatpush1.bf16.msra.mxu0 %v1177_v26  ;;  %v1209_v26 = vld [vmem:[#allocation14 + $0x30] sm:$0xff]  }
  0x96   :  { %502 = vmatprep.subr.bf16.mxu0 %v1182_v27  ;;  %v1210_v27 = vld [vmem:[#allocation14 + $0x28] sm:$0xff]  }
  0x99   :  { %503 = vmatpush1.bf16.msra.mxu0 %v1180_v28  ;;  %v1211_v28 = vld [vmem:[#allocation14 + $0x20] sm:$0xff]  }
  0x9a   :  { %504 = vmatprep.subr.bf16.mxu0 %v1185_v29  ;;  %v1212_v29 = vld [vmem:[#allocation14 + $0x18] sm:$0xff]  }
  0x9d   :  { %505 = vmatpush1.bf16.msra.mxu0 %v1183_v30  ;;  %v1213_v30 = vld [vmem:[#allocation14 + $0x10] sm:$0xff]  }
  0x9e   :  { %506 = vmatprep.subr.bf16.mxu0 %v1188_v31  ;;  %v962_v31 = vld [vmem:[%s1680_s9] ss:$0 sm:$0xff]  ;;  %s1467_s9 = smov [#allocation17]  }
  0x9f   :  { %s898_s1 = sshll.u32 %s1467_s9, 4  ;;  %s899_s1 = int_to_ptr.vmem [resolvable:$true] %s898_s1 }
  0xa0   :  { %s1378_s20 = scalar_lea.vmem %s899_s1, 128  ;;  %p1383_p13 = scmp.lt.s32.totalorder %s899_s1, %s899_s1 }
  0xa1   :  { %507 = vmatpush1.bf16.msra.mxu0 %v1186_v32  ;;  %p1379_p12 = scmp.ne.s32.totalorder %s899_s1, %s1378_s20  ;;  %p1384_p0 = scmp.lt.s32.totalorder %s1378_s20, %s1378_s20 }
  0xa2   :  { %508 = vmatprep.subr.bf16.mxu0 %v1191_v41  ;;  %v971_v41 = vld [vmem:[%s1682_s11] ss:$0 sm:$0xff] }
  0xa3   :  { %p1385_p1 = por %p1384_p0, %p1383_p13 }
  0xa5   :  { %509 = vmatpush1.bf16.msra.mxu0 %v1189_v42  ;;  %p1386_p2 = pnand %p1385_p1, %p1379_p12 }
  0xa6   :  { %1094 = vmatprep.subr.bf16.mxu0 %v1464_v0 }
 0x148   :  { %v265_v34 = vpop.f32.mrf.mxu0 }
 0x149   :  { %v266_v35 = vadd.f32 %v928_v33, %v265_v34 }
 0x14a   :  { %v1052_v36 = vpop.f32.mrf.mxu0 }
 0x14b   :  { %v271_v37 = vmax.f32 %v266_v35, 0.0 }
 0x14c   :  { %v268_v38 = vpop.f32.mrf.mxu0 }
 0x14d   :  { %v272_v39 = vpack.c.bf16 %v271_v37, %v271_v37 }
 0x14e   :  { %v1053_v40 = vpop.f32.mrf.mxu0 }
 0x14f   :  { %1071 = vmatmul.mubr.bf16.vlgmr.msra.gmra.mxu1 %v272_v39  ;;  %v1214_v39 = vld [vmem:[#allocation14 + $0x8] sm:$0xff]   ;;  %v1215_v40 = vld [vmem:[#allocation14] sm:$0xff]  }
 0x150   :  { %1090 = vmatprep.mubr.msk.bf16.mxu1 %vm1465_vm0, %v1464_v0  ;;  %1075 = vmatpush3.bf16.msra.mxu1 %v1192_v44 }
 0x151   :  { %1076 = vmatprep.subr.bf16.mxu1 %v1464_v0 }
 0x154   :  { %1077 = vmatpush3.bf16.msra.mxu1 %v1193_v53 }
 0x155   :  { %1078 = vmatprep.subr.bf16.mxu1 %v1464_v0 }
 0x158   :  { %1079 = vmatpush3.bf16.msra.mxu1 %v1194_v54 }
 0x159   :  { %1080 = vmatprep.subr.bf16.mxu1 %v1464_v0 }
 0x15c   :  { %1081 = vmatpush3.bf16.msra.mxu1 %v1195_v55 }
 0x15d   :  { %1082 = vmatprep.subr.bf16.mxu1 %v1464_v0 }
 0x160   :  { %1083 = vmatpush3.bf16.msra.mxu1 %v1196_v56 }
 0x161   :  { %1084 = vmatprep.subr.bf16.mxu1 %v1464_v0 }
 0x164   :  { %1085 = vmatpush3.bf16.msra.mxu1 %v1197_v57 }
 0x165   :  { %1086 = vmatprep.subr.bf16.mxu1 %v1464_v0 }
 0x168   :  { %1087 = vmatpush3.bf16.msra.mxu1 %v1198_v58 }
 0x169   :  { %1088 = vmatprep.subr.bf16.mxu1 %v1464_v0 }
 0x16c   :  { %1089 = vmatpush3.bf16.msra.mxu1 %v1199_v59 }
 0x16d   :  { %1114 = vmatprep.subr.bf16.mxu1 %v1464_v0 }
 0x20f   :  { %v378_v46 = vpop.f32.mrf.mxu1 }
 0x210   :  { %v379_v47 = vadd.f32 %v937_v45, %v378_v46 }
 0x211   :  { %v1072_v48 = vpop.f32.mrf.mxu1 }
 0x212   :  { %v384_v49 = vmax.f32 %v379_v47, 0.0 }
 0x213   :  { %v381_v50 = vpop.f32.mrf.mxu1 }
 0x214   :  { %v385_v51 = vpack.c.bf16 %v384_v49, %v384_v49 }
 0x215   :  { %v1073_v52 = vpop.f32.mrf.mxu1 }
 0x216   :  { %527 = vmatmul.mubr.bf16.vlgmr.msra.gmra.mxu0 %v385_v51 }
 0x217   :  { %1110 = vmatprep.mubr.msk.bf16.mxu0 %vm1465_vm0, %v1464_v0  ;;  %1095 = vmatpush3.bf16.msra.mxu0 %v1200_v60 }
 0x218   :  { %1096 = vmatprep.subr.bf16.mxu0 %v1464_v0 }
 0x21b   :  { %1097 = vmatpush3.bf16.msra.mxu0 %v1201_v61 }
 0x21c   :  { %1098 = vmatprep.subr.bf16.mxu0 %v1464_v0 }
 0x21f   :  { %1099 = vmatpush3.bf16.msra.mxu0 %v1202_v62 }
 0x220   :  { %1100 = vmatprep.subr.bf16.mxu0 %v1464_v0 }
 0x223   :  { %1101 = vmatpush3.bf16.msra.mxu0 %v1203_v63 }
 0x224   :  { %1102 = vmatprep.subr.bf16.mxu0 %v1464_v0 }
 0x227   :  { %1103 = vmatpush3.bf16.msra.mxu0 %v1204_v1 }
 0x228   :  { %1104 = vmatprep.subr.bf16.mxu0 %v1464_v0 }
 0x22b   :  { %1105 = vmatpush3.bf16.msra.mxu0 %v1205_v2 }
 0x22c   :  { %1106 = vmatprep.subr.bf16.mxu0 %v1464_v0 }
 0x22f   :  { %1107 = vmatpush3.bf16.msra.mxu0 %v1206_v23 }
 0x230   :  { %1108 = vmatprep.subr.bf16.mxu0 %v1464_v0 }
 0x233   :  { %1109 = vmatpush3.bf16.msra.mxu0 %v1207_v24 }
 0x2d6   :  { %v528_v10 = vpop.f32.mrf.mxu0 }
 0x2d7   :  { %v529_v11 = vadd.f32 %v528_v10, %v407_v8 }
 0x2d8   :  { %v530_v12 = vpop.f32.mrf.mxu0 }
 0x2d9   :  { %880 = vst [vmem:[#allocation17] sm:$0xff] %v529_v11  ;;  %v531_v13 = vadd.f32 %v530_v12, %v411_v9 }
 0x2da   :  { %v532_v14 = vpop.f32.mrf.mxu0 }
 0x2db   :  { %v535_v15 = vmul.f32 0.5, %v531_v13  ;;  %881 = vst [vmem:[#allocation19] sm:$0xff] %v531_v13 }
 0x2dc   :  { %v533_v16 = vpop.f32.mrf.mxu0 }
 0x2dd   :  { %v536_v17 = vmul.f32 1.442695, %v535_v15 }
 0x2df   :  { %1216 = vpow2.f32 %v536_v17 }
 0x2ec   :  { %v1217_v19 = vpop.eup %1216 }
 0x2ed   :  { %v539_v20 = vmul.f32 %v1217_v19, %v538_v18 }
 0x2ef   :  { %v540_v21 = vadd.f32 %v539_v20, %v529_v11 }
 0x2f1   :  { %v541_v22 = vpack.c.bf16 %v540_v21, %v540_v21 }
 0x2f3   :  { %1091 = vmatmul.mubr.bf16.vlgmr.msra.gmra.mxu1 %v541_v22 }
 0x2f4   :  { %1130 = vmatprep.mubr.msk.bf16.mxu1 %vm1465_vm0, %v1464_v0  ;;  %1115 = vmatpush3.bf16.msra.mxu1 %v1208_v25 }
 0x2f5   :  { %1116 = vmatprep.subr.bf16.mxu1 %v1464_v0 }
 0x2f8   :  { %1117 = vmatpush3.bf16.msra.mxu1 %v1209_v26 }
 0x2f9   :  { %1118 = vmatprep.subr.bf16.mxu1 %v1464_v0 }
 0x2fc   :  { %1119 = vmatpush3.bf16.msra.mxu1 %v1210_v27 }
 0x2fd   :  { %1120 = vmatprep.subr.bf16.mxu1 %v1464_v0 }
 0x300   :  { %1121 = vmatpush3.bf16.msra.mxu1 %v1211_v28 }
 0x301   :  { %1122 = vmatprep.subr.bf16.mxu1 %v1464_v0 }
 0x304   :  { %1123 = vmatpush3.bf16.msra.mxu1 %v1212_v29 }
 0x305   :  { %1124 = vmatprep.subr.bf16.mxu1 %v1464_v0 }
 0x308   :  { %1125 = vmatpush3.bf16.msra.mxu1 %v1213_v30 }
 0x309   :  { %1126 = vmatprep.subr.bf16.mxu1 %v1464_v0 }
 0x30c   :  { %1127 = vmatpush3.bf16.msra.mxu1 %v1214_v39 }
 0x30d   :  { %1128 = vmatprep.subr.bf16.mxu1 %v1464_v0 }
 0x310   :  { %1129 = vmatpush3.bf16.msra.mxu1 %v1215_v40 }
 0x3b3   :  { %v647_v32 = vpop.f32.mrf.mxu1 }
 0x3b4   :  { %v648_v33 = vadd.f32 %v962_v31, %v647_v32 }
 0x3b5   :  { %v1092_v34 = vpop.f32.mrf.mxu1 }
 0x3b6   :  { %v653_v35 = vmax.f32 %v648_v33, 0.0 }
 0x3b7   :  { %v650_v36 = vpop.f32.mrf.mxu1 }
 0x3b8   :  { %v654_v37 = vpack.c.bf16 %v653_v35, %v653_v35 }
 0x3b9   :  { %v1093_v38 = vpop.f32.mrf.mxu1 }
 0x3ba   :  { %1111 = vmatmul.mubr.bf16.vlgmr.msra.gmra.mxu0 %v654_v37 }
 0x47a   :  { %v760_v42 = vpop.f32.mrf.mxu0 }
 0x47b   :  { %v761_v43 = vadd.f32 %v971_v41, %v760_v42 }
 0x47c   :  { %v1112_v44 = vpop.f32.mrf.mxu0 }
 0x47d   :  { %v766_v45 = vmax.f32 %v761_v43, 0.0 }
 0x47e   :  { %v763_v46 = vpop.f32.mrf.mxu0 }
 0x47f   :  { %v767_v47 = vpack.c.bf16 %v766_v45, %v766_v45 }
 0x480   :  { %v1113_v48 = vpop.f32.mrf.mxu0 }
 0x481   :  { %1131 = vmatmul.mubr.bf16.vlgmr.msra.gmra.mxu1 %v767_v47 }
 0x482   :  { %1389 = shalt.err (!%p1386_p2)
}
 0x483   :  { %901 = dma.vmem_to_hbm [thread:$0]  %s899_s1, 128, %s1686_s15, [#allocation18]  }
 0x484   :  { %s1468_s22 = smov [#allocation19]  }
 0x485   :  { %s908_s23 = sshll.u32 %s1468_s22, 4  ;;  %s909_s23 = int_to_ptr.vmem [resolvable:$true] %s908_s23 }
 0x486   :  { %s1398_s24 = scalar_lea.vmem %s909_s23, 128  ;;  %p1403_p4 = scmp.lt.s32.totalorder %s909_s23, %s909_s23 }
 0x487   :  { %p1399_p3 = scmp.ne.s32.totalorder %s909_s23, %s1398_s24  ;;  %p1404_p5 = scmp.lt.s32.totalorder %s1398_s24, %s1398_s24 }
 0x489   :  { %p1405_p6 = por %p1404_p5, %p1403_p4 }
 0x48b   :  { %p1406_p7 = pnand %p1405_p6, %p1399_p3 }
 0x48d   :  { %1409 = shalt.err (!%p1406_p7)
}
 0x48e   :  { %911 = dma.vmem_to_hbm [thread:$0]  %s909_s23, 128, %s1687_s16, [#allocation18]   ;;  %v980_v0 = vld [vmem:[%s1684_s13] ss:$0 sm:$0xff] }
 0x48f   :  { %s1469_s27 = smov [#allocation16]  }
 0x490   :  { %s888_s15 = sshll.u32 %s1469_s27, 4  ;;  %s889_s15 = int_to_ptr.vmem [resolvable:$true] %s888_s15 }
 0x491   :  { %s1418_s28 = scalar_lea.vmem %s889_s15, 128  ;;  %p1423_p9 = scmp.lt.s32.totalorder %s889_s15, %s889_s15 }
 0x492   :  { %p1419_p8 = scmp.ne.s32.totalorder %s889_s15, %s1418_s28  ;;  %p1424_p10 = scmp.lt.s32.totalorder %s1418_s28, %s1418_s28 }
 0x494   :  { %p1425_p11 = por %p1424_p10, %p1423_p9 }
 0x496   :  { %p1426_p12 = pnand %p1425_p11, %p1419_p8 }
 0x541   :  { %v873_v49 = vpop.f32.mrf.mxu1 }
 0x542   :  { %v874_v50 = vadd.f32 %v980_v0, %v873_v49 }
 0x543   :  { %v1132_v51 = vpop.f32.mrf.mxu1 }
 0x544   :  { %879 = vst [vmem:[#allocation16] sm:$0xff] %v874_v50 }
 0x545   :  { %v876_v52 = vpop.f32.mrf.mxu1 }
 0x546   :  { %1429 = shalt.err (!%p1426_p12)
}
 0x547   :  { %891 = dma.vmem_to_hbm [thread:$0]  %s889_s15, 128, %s1685_s14, [#allocation4]   ;;  %v1133_v53 = vpop.f32.mrf.mxu1 }
 0x548   :  { %1448 = dma.done.wait [#allocation4], 128  }
 0x549   :  { %1449 = vsyncadd [#allocation4], 4294967168 }
 0x54a   :  { %1450 = dma.done.wait [#allocation18], 256  }
 0x54b   :  { %1451 = vsyncadd [#allocation18], 4294967040 }
 0x54c   :  { %921 = vsyncpa [#allocation3], 1 }
 0x54d   :  { %922 = vsyncpa [#allocation6], 1 }
 0x54e   :  { %923 = vsyncpa [#allocation9], 1 }
 0x54f   :  { %924 = vsyncpa [#allocation12], 1 }
 0x550   :  { %925 = vsyncpa [#allocation15], 1 }
 0x551   :  { %926 = vsyncpa [#allocation4], 1 }
 0x552   :  { %927 = vsyncpa [#allocation18], 1 }

// kernel: tpu_custom_call.1
= control target key start
LH: loop header
LB: loop body
LE: loop exit
PB: predicated region body
PF: predicated region fallthrough
CT: control target
= control target key end

     0   :  { %s1671_s0 = inlined_call_operand.hbm [shape: f32[8,128], index: 0, kind: input, shape index: {}]   ;;  %s1672_s1 = inlined_call_operand.hbm [shape: f32[8,128], index: 1, kind: input, shape index: {}]   ;;  %s1673_s2 = inlined_call_operand.hbm [shape: bf16[128,128], index: 2, kind: input, shape index: {}]   ;;  %s1674_s3 = inlined_call_operand.vmem [shape: f32[1,128], index: 3, kind: input, shape index: {}]   ;;  %s1675_s4 = inlined_call_operand.hbm [shape: bf16[128,128], index: 4, kind: input, shape index: {}]   ;;  %s1676_s5 = inlined_call_operand.vmem [shape: f32[1,128], index: 5, kind: input, shape index: {}]   ;;  %s1677_s6 = inlined_call_operand.hbm [shape: bf16[128,256], index: 6, kind: input, shape index: {}]   ;;  %s1678_s7 = inlined_call_operand.vmem [shape: f32[1,256], index: 7, kind: input, shape index: {}]   ;;  %s1679_s8 = inlined_call_operand.hbm [shape: bf16[128,128], index: 8, kind: input, shape index: {}]   ;;  %s1680_s9 = inlined_call_operand.vmem [shape: f32[1,128], index: 9, kind: input, shape index: {}]   ;;  %s1681_s10 = inlined_call_operand.hbm [shape: bf16[128,128], index: 10, kind: input, shape index: {}]   ;;  %s1682_s11 = inlined_call_operand.vmem [shape: f32[1,128], index: 11, kind: input, shape index: {}]   ;;  %s1683_s12 = inlined_call_operand.hbm [shape: bf16[128,128], index: 12, kind: input, shape index: {}]   ;;  %s1684_s13 = inlined_call_operand.vmem [shape: f32[1,128], index: 13, kind: input, shape index: {}]   ;;  %s1685_s14 = inlined_call_operand.hbm [shape: f32[8,128], index: 14, kind: output, shape index: {0}]   ;;  %s1686_s15 = inlined_call_operand.hbm [shape: f32[8,128], index: 15, kind: output, shape index: {1}]   ;;  %s1687_s16 = inlined_call_operand.hbm [shape: f32[8,128], index: 16, kind: output, shape index: {2}]  }
   0x1   :  { %1688 = sst [smem:[#allocation27_spill]] %s1671_s0 }
   0x2   :  { %22 = vsyncpa [#allocation3], 0 }
   0x3   :  { %23 = vsyncpa [#allocation6], 0 }
   0x4   :  { %24 = vsyncpa [#allocation9], 0 }
   0x5   :  { %25 = vsyncpa [#allocation12], 0 }
   0x6   :  { %26 = vsyncpa [#allocation15], 0 }
   0x7   :  { %27 = vsyncpa [#allocation4], 0 }
   0x8   :  { %28 = vsyncpa [#allocation18], 0  ;;  %s1452_s21 = smov [#allocation5]  }
   0x9   :  { %s45_s22 = sshll.u32 %s1452_s21, 4  ;;  %s46_s22 = int_to_ptr.vmem [resolvable:$true] %s45_s22 }
   0xa   :  { %s1226_s23 = scalar_lea.vmem %s46_s22, 128  ;;  %p1231_p1 = scmp.lt.s32.totalorder %s46_s22, %s46_s22 }
   0xb   :  { %p1227_p0 = scmp.ne.s32.totalorder %s46_s22, %s1226_s23  ;;  %p1232_p2 = scmp.lt.s32.totalorder %s1226_s23, %s1226_s23 }
   0xd   :  { %p1233_p3 = por %p1232_p2, %p1231_p1 }
   0xf   :  { %p1234_p4 = pnand %p1233_p3, %p1227_p0 }
  0x11   :  { %1237 = shalt.err (!%p1234_p4)
}
  0x12   :  { %48 = dma.hbm_to_vmem [thread:$0]  %s1672_s1, 128, %s46_s22, [#allocation6]  }
  0x13   :  { %s1453_s26 = smov [#allocation8]   ;;  %s1454_s28 = smov [#allocation11]  }
  0x14   :  { %s68_s27 = sshll.u32 %s1453_s26, 4  ;;  %s96_s29 = sshll.u32 %s1454_s28, 4  ;;  %s69_s27 = int_to_ptr.vmem [resolvable:$true] %s68_s27  ;;  %s97_s29 = int_to_ptr.vmem [resolvable:$true] %s96_s29 }
  0x15   :  { %s1246_s30 = scalar_lea.vmem %s69_s27, 1024  ;;  %p1251_p6 = scmp.lt.s32.totalorder %s69_s27, %s69_s27 }
  0x16   :  { %p1247_p5 = scmp.ne.s32.totalorder %s69_s27, %s1246_s30  ;;  %p1252_p7 = scmp.lt.s32.totalorder %s1246_s30, %s1246_s30 }
  0x18   :  { %p1253_p8 = por %p1252_p7, %p1251_p6 }
  0x1a   :  { %p1254_p9 = pnand %p1253_p8, %p1247_p5 }
  0x1c   :  { %1257 = shalt.err (!%p1254_p9)
}
  0x1d   :  { %s1455_s0 = smov 64   ;;  %s1456_s17 = smov 4  }
  0x1e   :  { %74 = dma.hbm_to_vmem [thread:$0]  %s1675_s4, 1024, %s69_s27, [#allocation9], %s1455_s0, %s1455_s0, %s1456_s17  }
  0x1f   :  { %s1266_s1 = scalar_lea.vmem %s97_s29, 1024  ;;  %p1271_p11 = scmp.lt.s32.totalorder %s97_s29, %s97_s29 }
  0x20   :  { %p1267_p10 = scmp.ne.s32.totalorder %s97_s29, %s1266_s1  ;;  %p1272_p12 = scmp.lt.s32.totalorder %s1266_s1, %s1266_s1 }
  0x22   :  { %p1273_p13 = por %p1272_p12, %p1271_p11 }
  0x24   :  { %p1274_p0 = pnand %p1273_p13, %p1267_p10 }
  0x26   :  { %1277 = shalt.err (!%p1274_p0)
}
  0x27   :  { %102 = dma.hbm_to_vmem [thread:$0]  %s1679_s8, 1024, %s97_s29, [#allocation12], %s1455_s0, %s1455_s0, %s1456_s17  }
  0x28   :  { %s1457_s22 = smov [#allocation2]   ;;  %s1458_s24 = smov [#allocation7]  }
  0x29   :  { %s35_s23 = sshll.u32 %s1457_s22, 4  ;;  %s54_s4 = sshll.u32 %s1458_s24, 4  ;;  %s36_s23 = int_to_ptr.vmem [resolvable:$true] %s35_s23  ;;  %s55_s4 = int_to_ptr.vmem [resolvable:$true] %s54_s4 }
  0x2a   :  { %s1286_s25 = scalar_lea.vmem %s36_s23, 128  ;;  %p1291_p2 = scmp.lt.s32.totalorder %s36_s23, %s36_s23 }
  0x2b   :  { %p1287_p1 = scmp.ne.s32.totalorder %s36_s23, %s1286_s25  ;;  %p1292_p3 = scmp.lt.s32.totalorder %s1286_s25, %s1286_s25 }
  0x2d   :  { %p1293_p4 = por %p1292_p3, %p1291_p2 }
  0x2f   :  { %p1294_p5 = pnand %p1293_p4, %p1287_p1 }
  0x31   :  { %1297 = shalt.err (!%p1294_p5)
}
  0x32   :  { %s1689_s28 = sld [smem:[#allocation27_spill]]  ;;  %s1306_s30 = scalar_lea.vmem %s55_s4, 1024 }
  0x33   :  { %p1307_p6 = scmp.ne.s32.totalorder %s55_s4, %s1306_s30  ;;  %p1311_p7 = scmp.lt.s32.totalorder %s55_s4, %s55_s4 }
  0x34   :  { %p1312_p8 = scmp.lt.s32.totalorder %s1306_s30, %s1306_s30 }
  0x36   :  { %p1313_p9 = por %p1312_p8, %p1311_p7 }
  0x38   :  { %38 = dma.hbm_to_vmem [thread:$0]  %s1689_s28, 128, %s36_s23, [#allocation3]  }
  0x39   :  { %p1314_p10 = pnand %p1313_p9, %p1307_p6 }
  0x3b   :  { %1317 = shalt.err (!%p1314_p10)
}
  0x3c   :  { %60 = dma.hbm_to_vmem [thread:$0]  %s1673_s2, 1024, %s55_s4, [#allocation6], %s1455_s0, %s1455_s0, %s1456_s17  }
  0x3d   :  { %s1459_s18 = smov [#allocation10]  }
  0x3e   :  { %s82_s19 = sshll.u32 %s1459_s18, 4  ;;  %s83_s19 = int_to_ptr.vmem [resolvable:$true] %s82_s19 }
  0x3f   :  { %s1326_s1 = scalar_lea.vmem %s83_s19, 2048  ;;  %p1331_p12 = scmp.lt.s32.totalorder %s83_s19, %s83_s19 }
  0x40   :  { %p1327_p11 = scmp.ne.s32.totalorder %s83_s19, %s1326_s1  ;;  %p1332_p13 = scmp.lt.s32.totalorder %s1326_s1, %s1326_s1 }
  0x42   :  { %p1333_p0 = por %p1332_p13, %p1331_p12 }
  0x44   :  { %p1334_p1 = pnand %p1333_p0, %p1327_p11 }
  0x46   :  { %1337 = shalt.err (!%p1334_p1)
}
  0x47   :  { %s1460_s20 = smov 128   ;;  %s1461_s21 = smov 8  }
  0x48   :  { %88 = dma.hbm_to_vmem [thread:$0]  %s1677_s6, 2048, %s83_s19, [#allocation9], %s1460_s20, %s1460_s20, %s1461_s21  }
  0x49   :  { %s1462_s24 = smov [#allocation13]   ;;  %s1463_s26 = smov [#allocation14]  }
  0x4a   :  { %s110_s25 = sshll.u32 %s1462_s24, 4  ;;  %s124_s2 = sshll.u32 %s1463_s26, 4  ;;  %s111_s25 = int_to_ptr.vmem [resolvable:$true] %s110_s25  ;;  %s125_s2 = int_to_ptr.vmem [resolvable:$true] %s124_s2 }
  0x4b   :  { %s1346_s4 = scalar_lea.vmem %s111_s25, 1024  ;;  %p1351_p3 = scmp.lt.s32.totalorder %s111_s25, %s111_s25 }
  0x4c   :  { %p1347_p2 = scmp.ne.s32.totalorder %s111_s25, %s1346_s4  ;;  %p1352_p4 = scmp.lt.s32.totalorder %s1346_s4, %s1346_s4 }
  0x4e   :  { %p1353_p5 = por %p1352_p4, %p1351_p3 }
  0x50   :  { %p1354_p6 = pnand %p1353_p5, %p1347_p2 }
  0x52   :  { %1357 = shalt.err (!%p1354_p6)
}
  0x53   :  { %116 = dma.hbm_to_vmem [thread:$0]  %s1681_s10, 1024, %s111_s25, [#allocation12], %s1455_s0, %s1455_s0, %s1456_s17  }
  0x54   :  { %s1366_s6 = scalar_lea.vmem %s125_s2, 1024  ;;  %p1371_p8 = scmp.lt.s32.totalorder %s125_s2, %s125_s2 }
  0x55   :  { %p1367_p7 = scmp.ne.s32.totalorder %s125_s2, %s1366_s6  ;;  %p1372_p9 = scmp.lt.s32.totalorder %s1366_s6, %s1366_s6 }
  0x57   :  { %p1373_p10 = por %p1372_p9, %p1371_p8 }
  0x59   :  { %p1374_p11 = pnand %p1373_p10, %p1367_p7 }
  0x5b   :  { %1377 = shalt.err (!%p1374_p11)
}
  0x5c   :  { %130 = dma.hbm_to_vmem [thread:$0]  %s1683_s12, 1024, %s125_s2, [#allocation15], %s1455_s0, %s1455_s0, %s1456_s17  }
  0x5d   :  { %1438 = dma.done.wait [#allocation3], 128  }
  0x5e   :  { %1439 = vsyncadd [#allocation3], 4294967168 }
  0x5f   :  { %1440 = dma.done.wait [#allocation6], 1152  }
  0x60   :  { %1441 = vsyncadd [#allocation6], 4294966144 }
  0x61   :  { %1442 = dma.done.wait [#allocation9], 3072  }
  0x62   :  { %1443 = vsyncadd [#allocation9], 4294964224 }
  0x63   :  { %1444 = dma.done.wait [#allocation12], 2048  }
  0x64   :  { %1445 = vsyncadd [#allocation12], 4294965248 }
  0x65   :  { %1446 = dma.done.wait [#allocation15], 1024  }
  0x66   :  { %1447 = vsyncadd [#allocation15], 4294966272  ;;  %v1464_v0 = vmov 0.0   ;;  %vm1465_vm0 = vmmov 0   ;;  %v1152_v1 = vld [vmem:[#allocation7 + $0x38] sm:$0xff]   ;;  %v1153_v2 = vld [vmem:[#allocation7 + $0x30] sm:$0xff]  }
  0x67   :  { %1034 = vmatprep.subr.bf16.mxu0 %v1464_v0  ;;  %1050 = vmatprep.mubr.msk.bf16.mxu0 %vm1465_vm0, %v1464_v0  ;;  %v1154_v3 = vld [vmem:[#allocation7 + $0x28] sm:$0xff]   ;;  %v1160_v4 = vld [vmem:[#allocation8 + $0x38] sm:$0xff]   ;;  %v1155_v5 = vld [vmem:[#allocation7 + $0x20] sm:$0xff]   ;;  %v1466_v43 = vmov 0  }
  0x68   :  { %1054 = vmatprep.subr.bf16.mxu1 %v1464_v0  ;;  %1070 = vmatprep.mubr.msk.bf16.mxu1 %vm1465_vm0, %v1464_v0  ;;  %v1161_v6 = vld [vmem:[#allocation8 + $0x30] sm:$0xff]   ;;  %v1156_v7 = vld [vmem:[#allocation7 + $0x18] sm:$0xff]   ;;  %v1162_v8 = vld [vmem:[#allocation8 + $0x28] sm:$0xff]  }
  0x69   :  { %1035 = vmatpush3.bf16.msra.mxu0 %v1152_v1  ;;  %1055 = vmatpush3.bf16.msra.mxu1 %v1160_v4  ;;  %v1157_v9 = vld [vmem:[#allocation7 + $0x10] sm:$0xff]   ;;  %v1163_v10 = vld [vmem:[#allocation8 + $0x20] sm:$0xff]   ;;  %v1158_v11 = vld [vmem:[#allocation7 + $0x8] sm:$0xff]  }
  0x6a   :  { %1036 = vmatprep.subr.bf16.mxu0 %v1464_v0  ;;  %1056 = vmatprep.subr.bf16.mxu1 %v1464_v0  ;;  %v1164_v12 = vld [vmem:[#allocation8 + $0x18] sm:$0xff]   ;;  %v1159_v13 = vld [vmem:[#allocation7] sm:$0xff]   ;;  %v158_v14 = vld [vmem:[#allocation2] sm:$0xff] }
  0x6b   :  { %v1165_v15 = vld [vmem:[#allocation8 + $0x10] sm:$0xff]   ;;  %v159_v16 = vpack.c.bf16 %v158_v14, %v158_v14  ;;  %v1166_v17 = vld [vmem:[#allocation8 + $0x8] sm:$0xff]   ;;  %v1167_v18 = vld [vmem:[#allocation8] sm:$0xff]  }
  0x6c   :  { %v1168_v19 = vld [vmem:[#allocation10 + $0x70] ss:$8 sps:$4 sm:$0xff]   ;;  %v1170_v20 = vld [vmem:[#allocation10 + $0x74] ss:$8 sps:$4 sm:$0xff]   ;;  %v1173_v21 = vld [vmem:[#allocation10 + $0x64] ss:$8 sps:$4 sm:$0xff]  }
  0x6d   :  { %1037 = vmatpush3.bf16.msra.mxu0 %v1153_v2  ;;  %1057 = vmatpush3.bf16.msra.mxu1 %v1161_v6  ;;  %v1171_v22 = vld [vmem:[#allocation10 + $0x60] ss:$8 sps:$4 sm:$0xff]   ;;  %v1176_v23 = vld [vmem:[#allocation10 + $0x54] ss:$8 sps:$4 sm:$0xff]   ;;  %v1174_v24 = vld [vmem:[#allocation10 + $0x50] ss:$8 sps:$4 sm:$0xff]  }
  0x6e   :  { %1038 = vmatprep.subr.bf16.mxu0 %v1464_v0  ;;  %1058 = vmatprep.subr.bf16.mxu1 %v1464_v0  ;;  %v1179_v25 = vld [vmem:[#allocation10 + $0x44] ss:$8 sps:$4 sm:$0xff]   ;;  %v1177_v26 = vld [vmem:[#allocation10 + $0x40] ss:$8 sps:$4 sm:$0xff]   ;;  %v1182_v27 = vld [vmem:[#allocation10 + $0x34] ss:$8 sps:$4 sm:$0xff]  }
  0x6f   :  { %v1180_v28 = vld [vmem:[#allocation10 + $0x30] ss:$8 sps:$4 sm:$0xff]   ;;  %v1185_v29 = vld [vmem:[#allocation10 + $0x24] ss:$8 sps:$4 sm:$0xff]   ;;  %v1183_v30 = vld [vmem:[#allocation10 + $0x20] ss:$8 sps:$4 sm:$0xff]  }
  0x70   :  { %v1188_v31 = vld [vmem:[#allocation10 + $0x14] ss:$8 sps:$4 sm:$0xff]   ;;  %v1186_v32 = vld [vmem:[#allocation10 + $0x10] ss:$8 sps:$4 sm:$0xff]   ;;  %v1191_v41 = vld [vmem:[#allocation10 + $0x4] ss:$8 sps:$4 sm:$0xff]  }
  0x71   :  { %1039 = vmatpush3.bf16.msra.mxu0 %v1154_v3  ;;  %1059 = vmatpush3.bf16.msra.mxu1 %v1162_v8  ;;  %v928_v33 = vld [vmem:[%s1674_s3] ss:$0 sm:$0xff]  ;;  %v1189_v42 = vld [vmem:[#allocation10] ss:$8 sps:$4 sm:$0xff]   ;;  %v1192_v44 = vld [vmem:[#allocation11 + $0x38] sm:$0xff]   ;;  %v404_v3 = vlaneseq }
  0x72   :  { %1040 = vmatprep.subr.bf16.mxu0 %v1464_v0  ;;  %1060 = vmatprep.subr.bf16.mxu1 %v1464_v0  ;;  %v937_v45 = vld [vmem:[%s1676_s5] ss:$0 sm:$0xff]  ;;  %v1194_v54 = vld [vmem:[#allocation11 + $0x28] sm:$0xff]   ;;  %v1195_v55 = vld [vmem:[#allocation11 + $0x20] sm:$0xff]  }
  0x73   :  { %v1193_v53 = vld [vmem:[#allocation11 + $0x30] sm:$0xff]   ;;  %v1196_v56 = vld [vmem:[#allocation11 + $0x18] sm:$0xff]   ;;  %v1198_v58 = vld [vmem:[#allocation11 + $0x8] sm:$0xff]   ;;  %v405_v4 = vshrl.u32 %v404_v3, 7 }
  0x74   :  { %v1197_v57 = vld [vmem:[#allocation11 + $0x10] sm:$0xff]   ;;  %v1199_v59 = vld [vmem:[#allocation11] sm:$0xff]   ;;  %v1200_v60 = vld [vmem:[#allocation13 + $0x38] sm:$0xff]  }
  0x75   :  { %1041 = vmatpush3.bf16.msra.mxu0 %v1155_v5  ;;  %1061 = vmatpush3.bf16.msra.mxu1 %v1163_v10  ;;  %v1201_v61 = vld [vmem:[#allocation13 + $0x30] sm:$0xff]   ;;  %v1202_v62 = vld [vmem:[#allocation13 + $0x28] sm:$0xff]   ;;  %v1203_v63 = vld [vmem:[#allocation13 + $0x20] sm:$0xff]   ;;  %v406_v5 = vsub.s32 0, %v405_v4 }
  0x76   :  { %1042 = vmatprep.subr.bf16.mxu0 %v1464_v0  ;;  %1062 = vmatprep.subr.bf16.mxu1 %v1464_v0  ;;  %v1204_v1 = vld [vmem:[#allocation13 + $0x18] sm:$0xff]   ;;  %v1205_v2 = vld [vmem:[#allocation13 + $0x10] sm:$0xff]  }
  0x77   :  { %v402_v6 = vld [vmem:[%s1678_s7] sm:$0x3] }
  0x78   :  { %v407_v8 = vrot.slane %v402_v6, %v406_v5 }
  0x79   :  { %1043 = vmatpush3.bf16.msra.mxu0 %v1156_v7  ;;  %1063 = vmatpush3.bf16.msra.mxu1 %v1164_v12  ;;  %v410_v7 = vsub.s32 1, %v405_v4 }
  0x7a   :  { %1044 = vmatprep.subr.bf16.mxu0 %v1464_v0  ;;  %1064 = vmatprep.subr.bf16.mxu1 %v1464_v0 }
  0x7d   :  { %1045 = vmatpush3.bf16.msra.mxu0 %v1157_v9  ;;  %1065 = vmatpush3.bf16.msra.mxu1 %v1165_v15  ;;  %v411_v9 = vrot.slane %v402_v6, %v410_v7 }
  0x7e   :  { %1046 = vmatprep.subr.bf16.mxu0 %v1464_v0  ;;  %1066 = vmatprep.subr.bf16.mxu1 %v1464_v0 }
  0x81   :  { %1047 = vmatpush3.bf16.msra.mxu0 %v1158_v11  ;;  %1067 = vmatpush3.bf16.msra.mxu1 %v1166_v17 }
  0x82   :  { %1048 = vmatprep.subr.bf16.mxu0 %v1464_v0  ;;  %1068 = vmatprep.subr.bf16.mxu1 %v1464_v0 }
  0x85   :  { %1049 = vmatpush3.bf16.msra.mxu0 %v1159_v13  ;;  %1069 = vmatpush3.bf16.msra.mxu1 %v1167_v18  ;;  %v538_v18 = vld [vmem:[#allocation5] sm:$0xff] }
  0x86   :  { %1074 = vmatprep.subr.bf16.mxu1 %v1464_v0  ;;  %494 = vmatprep.subr.bf16.mxu0 %v1170_v20 }
  0x88   :  { %1051 = vmatmul.mubr.bf16.vlgmr.msra.gmra.mxu0 %v159_v16 }
  0x89   :  { %495 = vmatpush1.bf16.msra.mxu0 %v1168_v19  ;;  %526 = vmatprep.mubr.bf16.mxu0 %v1466_v43 }
  0x8a   :  { %496 = vmatprep.subr.bf16.mxu0 %v1173_v21 }
  0x8d   :  { %497 = vmatpush1.bf16.msra.mxu0 %v1171_v22 }
  0x8e   :  { %498 = vmatprep.subr.bf16.mxu0 %v1176_v23  ;;  %v1206_v23 = vld [vmem:[#allocation13 + $0x8] sm:$0xff]  }
  0x91   :  { %499 = vmatpush1.bf16.msra.mxu0 %v1174_v24  ;;  %v1207_v24 = vld [vmem:[#allocation13] sm:$0xff]  }
  0x92   :  { %500 = vmatprep.subr.bf16.mxu0 %v1179_v25  ;;  %v1208_v25 = vld [vmem:[#allocation14 + $0x38] sm:$0xff]  }
  0x95   :  { %501 = vmatpush1.bf16.msra.mxu0 %v1177_v26  ;;  %v1209_v26 = vld [vmem:[#allocation14 + $0x30] sm:$0xff]  }
  0x96   :  { %502 = vmatprep.subr.bf16.mxu0 %v1182_v27  ;;  %v1210_v27 = vld [vmem:[#allocation14 + $0x28] sm:$0xff]  }
  0x99   :  { %503 = vmatpush1.bf16.msra.mxu0 %v1180_v28  ;;  %v1211_v28 = vld [vmem:[#allocation14 + $0x20] sm:$0xff]  }
  0x9a   :  { %504 = vmatprep.subr.bf16.mxu0 %v1185_v29  ;;  %v1212_v29 = vld [vmem:[#allocation14 + $0x18] sm:$0xff]  }
  0x9d   :  { %505 = vmatpush1.bf16.msra.mxu0 %v1183_v30  ;;  %v1213_v30 = vld [vmem:[#allocation14 + $0x10] sm:$0xff]  }
  0x9e   :  { %506 = vmatprep.subr.bf16.mxu0 %v1188_v31  ;;  %v962_v31 = vld [vmem:[%s1680_s9] ss:$0 sm:$0xff]  ;;  %s1467_s9 = smov [#allocation17]  }
  0x9f   :  { %s898_s1 = sshll.u32 %s1467_s9, 4  ;;  %s899_s1 = int_to_ptr.vmem [resolvable:$true] %s898_s1 }
  0xa0   :  { %s1378_s20 = scalar_lea.vmem %s899_s1, 128  ;;  %p1383_p13 = scmp.lt.s32.totalorder %s899_s1, %s899_s1 }
  0xa1   :  { %507 = vmatpush1.bf16.msra.mxu0 %v1186_v32  ;;  %p1379_p12 = scmp.ne.s32.totalorder %s899_s1, %s1378_s20  ;;  %p1384_p0 = scmp.lt.s32.totalorder %s1378_s20, %s1378_s20 }
  0xa2   :  { %508 = vmatprep.subr.bf16.mxu0 %v1191_v41  ;;  %v971_v41 = vld [vmem:[%s1682_s11] ss:$0 sm:$0xff] }
  0xa3   :  { %p1385_p1 = por %p1384_p0, %p1383_p13 }
  0xa5   :  { %509 = vmatpush1.bf16.msra.mxu0 %v1189_v42  ;;  %p1386_p2 = pnand %p1385_p1, %p1379_p12 }
  0xa6   :  { %1094 = vmatprep.subr.bf16.mxu0 %v1464_v0 }
 0x148   :  { %v265_v34 = vpop.f32.mrf.mxu0 }
 0x149   :  { %v266_v35 = vadd.f32 %v928_v33, %v265_v34 }
 0x14a   :  { %v1052_v36 = vpop.f32.mrf.mxu0 }
 0x14b   :  { %v271_v37 = vmax.f32 %v266_v35, 0.0 }
 0x14c   :  { %v268_v38 = vpop.f32.mrf.mxu0 }
 0x14d   :  { %v272_v39 = vpack.c.bf16 %v271_v37, %v271_v37 }
 0x14e   :  { %v1053_v40 = vpop.f32.mrf.mxu0 }
 0x14f   :  { %1071 = vmatmul.mubr.bf16.vlgmr.msra.gmra.mxu1 %v272_v39  ;;  %v1214_v39 = vld [vmem:[#allocation14 + $0x8] sm:$0xff]   ;;  %v1215_v40 = vld [vmem:[#allocation14] sm:$0xff]  }
 0x150   :  { %1090 = vmatprep.mubr.msk.bf16.mxu1 %vm1465_vm0, %v1464_v0  ;;  %1075 = vmatpush3.bf16.msra.mxu1 %v1192_v44 }
 0x151   :  { %1076 = vmatprep.subr.bf16.mxu1 %v1464_v0 }
 0x154   :  { %1077 = vmatpush3.bf16.msra.mxu1 %v1193_v53 }
 0x155   :  { %1078 = vmatprep.subr.bf16.mxu1 %v1464_v0 }
 0x158   :  { %1079 = vmatpush3.bf16.msra.mxu1 %v1194_v54 }
 0x159   :  { %1080 = vmatprep.subr.bf16.mxu1 %v1464_v0 }
 0x15c   :  { %1081 = vmatpush3.bf16.msra.mxu1 %v1195_v55 }
 0x15d   :  { %1082 = vmatprep.subr.bf16.mxu1 %v1464_v0 }
 0x160   :  { %1083 = vmatpush3.bf16.msra.mxu1 %v1196_v56 }
 0x161   :  { %1084 = vmatprep.subr.bf16.mxu1 %v1464_v0 }
 0x164   :  { %1085 = vmatpush3.bf16.msra.mxu1 %v1197_v57 }
 0x165   :  { %1086 = vmatprep.subr.bf16.mxu1 %v1464_v0 }
 0x168   :  { %1087 = vmatpush3.bf16.msra.mxu1 %v1198_v58 }
 0x169   :  { %1088 = vmatprep.subr.bf16.mxu1 %v1464_v0 }
 0x16c   :  { %1089 = vmatpush3.bf16.msra.mxu1 %v1199_v59 }
 0x16d   :  { %1114 = vmatprep.subr.bf16.mxu1 %v1464_v0 }
 0x20f   :  { %v378_v46 = vpop.f32.mrf.mxu1 }
 0x210   :  { %v379_v47 = vadd.f32 %v937_v45, %v378_v46 }
 0x211   :  { %v1072_v48 = vpop.f32.mrf.mxu1 }
 0x212   :  { %v384_v49 = vmax.f32 %v379_v47, 0.0 }
 0x213   :  { %v381_v50 = vpop.f32.mrf.mxu1 }
 0x214   :  { %v385_v51 = vpack.c.bf16 %v384_v49, %v384_v49 }
 0x215   :  { %v1073_v52 = vpop.f32.mrf.mxu1 }
 0x216   :  { %527 = vmatmul.mubr.bf16.vlgmr.msra.gmra.mxu0 %v385_v51 }
 0x217   :  { %1110 = vmatprep.mubr.msk.bf16.mxu0 %vm1465_vm0, %v1464_v0  ;;  %1095 = vmatpush3.bf16.msra.mxu0 %v1200_v60 }
 0x218   :  { %1096 = vmatprep.subr.bf16.mxu0 %v1464_v0 }
 0x21b   :  { %1097 = vmatpush3.bf16.msra.mxu0 %v1201_v61 }
 0x21c   :  { %1098 = vmatprep.subr.bf16.mxu0 %v1464_v0 }
 0x21f   :  { %1099 = vmatpush3.bf16.msra.mxu0 %v1202_v62 }
 0x220   :  { %1100 = vmatprep.subr.bf16.mxu0 %v1464_v0 }
 0x223   :  { %1101 = vmatpush3.bf16.msra.mxu0 %v1203_v63 }
 0x224   :  { %1102 = vmatprep.subr.bf16.mxu0 %v1464_v0 }
 0x227   :  { %1103 = vmatpush3.bf16.msra.mxu0 %v1204_v1 }
 0x228   :  { %1104 = vmatprep.subr.bf16.mxu0 %v1464_v0 }
 0x22b   :  { %1105 = vmatpush3.bf16.msra.mxu0 %v1205_v2 }
 0x22c   :  { %1106 = vmatprep.subr.bf16.mxu0 %v1464_v0 }
 0x22f   :  { %1107 = vmatpush3.bf16.msra.mxu0 %v1206_v23 }
 0x230   :  { %1108 = vmatprep.subr.bf16.mxu0 %v1464_v0 }
 0x233   :  { %1109 = vmatpush3.bf16.msra.mxu0 %v1207_v24 }
 0x2d6   :  { %v528_v10 = vpop.f32.mrf.mxu0 }
 0x2d7   :  { %v529_v11 = vadd.f32 %v528_v10, %v407_v8 }
 0x2d8   :  { %v530_v12 = vpop.f32.mrf.mxu0 }
 0x2d9   :  { %880 = vst [vmem:[#allocation17] sm:$0xff] %v529_v11  ;;  %v531_v13 = vadd.f32 %v530_v12, %v411_v9 }
 0x2da   :  { %v532_v14 = vpop.f32.mrf.mxu0 }
 0x2db   :  { %v535_v15 = vmul.f32 0.5, %v531_v13  ;;  %881 = vst [vmem:[#allocation19] sm:$0xff] %v531_v13 }
 0x2dc   :  { %v533_v16 = vpop.f32.mrf.mxu0 }
 0x2dd   :  { %v536_v17 = vmul.f32 1.442695, %v535_v15 }
 0x2df   :  { %1216 = vpow2.f32 %v536_v17 }
 0x2ec   :  { %v1217_v19 = vpop.eup %1216 }
 0x2ed   :  { %v539_v20 = vmul.f32 %v1217_v19, %v538_v18 }
 0x2ef   :  { %v540_v21 = vadd.f32 %v539_v20, %v529_v11 }
 0x2f1   :  { %v541_v22 = vpack.c.bf16 %v540_v21, %v540_v21 }
 0x2f3   :  { %1091 = vmatmul.mubr.bf16.vlgmr.msra.gmra.mxu1 %v541_v22 }
 0x2f4   :  { %1130 = vmatprep.mubr.msk.bf16.mxu1 %vm1465_vm0, %v1464_v0  ;;  %1115 = vmatpush3.bf16.msra.mxu1 %v1208_v25 }
 0x2f5   :  { %1116 = vmatprep.subr.bf16.mxu1 %v1464_v0 }
 0x2f8   :  { %1117 = vmatpush3.bf16.msra.mxu1 %v1209_v26 }
 0x2f9   :  { %1118 = vmatprep.subr.bf16.mxu1 %v1464_v0 }
 0x2fc   :  { %1119 = vmatpush3.bf16.msra.mxu1 %v1210_v27 }
 0x2fd   :  { %1120 = vmatprep.subr.bf16.mxu1 %v1464_v0 }
 0x300   :  { %1121 = vmatpush3.bf16.msra.mxu1 %v1211_v28 }
 0x301   :  { %1122 = vmatprep.subr.bf16.mxu1 %v1464_v0 }
 0x304   :  { %1123 = vmatpush3.bf16.msra.mxu1 %v1212_v29 }
 0x305   :  { %1124 = vmatprep.subr.bf16.mxu1 %v1464_v0 }
 0x308   :  { %1125 = vmatpush3.bf16.msra.mxu1 %v1213_v30 }
 0x309   :  { %1126 = vmatprep.subr.bf16.mxu1 %v1464_v0 }
 0x30c   :  { %1127 = vmatpush3.bf16.msra.mxu1 %v1214_v39 }
 0x30d   :  { %1128 = vmatprep.subr.bf16.mxu1 %v1464_v0 }
 0x310   :  { %1129 = vmatpush3.bf16.msra.mxu1 %v1215_v40 }
 0x3b3   :  { %v647_v32 = vpop.f32.mrf.mxu1 }
 0x3b4   :  { %v648_v33 = vadd.f32 %v962_v31, %v647_v32 }
 0x3b5   :  { %v1092_v34 = vpop.f32.mrf.mxu1 }
 0x3b6   :  { %v653_v35 = vmax.f32 %v648_v33, 0.0 }
 0x3b7   :  { %v650_v36 = vpop.f32.mrf.mxu1 }
 0x3b8   :  { %v654_v37 = vpack.c.bf16 %v653_v35, %v653_v35 }
 0x3b9   :  { %v1093_v38 = vpop.f32.mrf.mxu1 }
 0x3ba   :  { %1111 = vmatmul.mubr.bf16.vlgmr.msra.gmra.mxu0 %v654_v37 }
 0x47a   :  { %v760_v42 = vpop.f32.mrf.mxu0 }
 0x47b   :  { %v761_v43 = vadd.f32 %v971_v41, %v760_v42 }
 0x47c   :  { %v1112_v44 = vpop.f32.mrf.mxu0 }
 0x47d   :  { %v766_v45 = vmax.f32 %v761_v43, 0.0 }
 0x47e   :  { %v763_v46 = vpop.f32.mrf.mxu0 }
 0x47f   :  { %v767_v47 = vpack.c.bf16 %v766_v45, %v766_v45 }
 0x480   :  { %v1113_v48 = vpop.f32.mrf.mxu0 }
 0x481   :  { %1131 = vmatmul.mubr.bf16.vlgmr.msra.gmra.mxu1 %v767_v47 }
 0x482   :  { %1389 = shalt.err (!%p1386_p2)
}
 0x483   :  { %901 = dma.vmem_to_hbm [thread:$0]  %s899_s1, 128, %s1686_s15, [#allocation18]  }
 0x484   :  { %s1468_s22 = smov [#allocation19]  }
 0x485   :  { %s908_s23 = sshll.u32 %s1468_s22, 4  ;;  %s909_s23 = int_to_ptr.vmem [resolvable:$true] %s908_s23 }
 0x486   :  { %s1398_s24 = scalar_lea.vmem %s909_s23, 128  ;;  %p1403_p4 = scmp.lt.s32.totalorder %s909_s23, %s909_s23 }
 0x487   :  { %p1399_p3 = scmp.ne.s32.totalorder %s909_s23, %s1398_s24  ;;  %p1404_p5 = scmp.lt.s32.totalorder %s1398_s24, %s1398_s24 }
 0x489   :  { %p1405_p6 = por %p1404_p5, %p1403_p4 }
 0x48b   :  { %p1406_p7 = pnand %p1405_p6, %p1399_p3 }
 0x48d   :  { %1409 = shalt.err (!%p1406_p7)
}
 0x48e   :  { %911 = dma.vmem_to_hbm [thread:$0]  %s909_s23, 128, %s1687_s16, [#allocation18]   ;;  %v980_v0 = vld [vmem:[%s1684_s13] ss:$0 sm:$0xff] }
 0x48f   :  { %s1469_s27 = smov [#allocation16]  }
 0x490   :  { %s888_s15 = sshll.u32 %s1469_s27, 4  ;;  %s889_s15 = int_to_ptr.vmem [resolvable:$true] %s888_s15 }
 0x491   :  { %s1418_s28 = scalar_lea.vmem %s889_s15, 128  ;;  %p1423_p9 = scmp.lt.s32.totalorder %s889_s15, %s889_s15 }
 0x492   :  { %p1419_p8 = scmp.ne.s32.totalorder %s889_s15, %s1418_s28  ;;  %p1424_p10 = scmp.lt.s32.totalorder %s1418_s28, %s1418_s28 }
 0x494   :  { %p1425_p11 = por %p1424_p10, %p1423_p9 }
 0x496   :  { %p1426_p12 = pnand %p1425_p11, %p1419_p8 }
 0x541   :  { %v873_v49 = vpop.f32.mrf.mxu1 }
 0x542   :  { %v874_v50 = vadd.f32 %v980_v0, %v873_v49 }
 0x543   :  { %v1132_v51 = vpop.f32.mrf.mxu1 }
 0x544   :  { %879 = vst [vmem:[#allocation16] sm:$0xff] %v874_v50 }
 0x545   :  { %v876_v52 = vpop.f32.mrf.mxu1 }
 0x546   :  { %1429 = shalt.err (!%p1426_p12)
}
 0x547   :  { %891 = dma.vmem_to_hbm [thread:$0]  %s889_s15, 128, %s1685_s14, [#allocation4]   ;;  %v1133_v53 = vpop.f32.mrf.mxu1 }
 0x548   :  { %1448 = dma.done.wait [#allocation4], 128  }
 0x549   :  { %1449 = vsyncadd [#allocation4], 4294967168 }
 0x54a   :  { %1450 = dma.done.wait [#allocation18], 256  }
 0x54b   :  { %1451 = vsyncadd [#allocation18], 4294967040 }
 0x54c   :  { %921 = vsyncpa [#allocation3], 1 }
 0x54d   :  { %922 = vsyncpa [#allocation6], 1 }
 0x54e   :  { %923 = vsyncpa [#allocation9], 1 }
 0x54f   :  { %924 = vsyncpa [#allocation12], 1 }
 0x550   :  { %925 = vsyncpa [#allocation15], 1 }
 0x551   :  { %926 = vsyncpa [#allocation4], 1 }
 0x552   :  { %927 = vsyncpa [#allocation18], 1 }

</bundles_post_ra>
